<compile_context>
chip_gen: v7x
topology: tpu7x:2x2x1
jax: 0.10.0
libtpu: 0.0.40
codegen_flags: <defaults>
</compile_context>

<pallas_src>
import math

import jax
import jax.numpy as jnp
from jax import lax
from jax.experimental import pallas as pl
from jax.experimental.pallas import tpu as pltpu

_INV_SQRT2 = 1.0 / math.sqrt(2.0)


def _cdiv(a, b):
    return -(-a // b)


def _round_up(a, b):
    return _cdiv(a, b) * b


def _spec(shape, index_map, buffers=None):
    """BlockSpec, optionally with an explicit pipeline buffer count.

    buffers=1 is used for constant-index-map operands (weights/biases that are
    identical for every grid step) to avoid paying for a useless second buffer.
    Falls back to a plain BlockSpec if this JAX has no `pipeline_mode`.
    """
    if buffers is not None and hasattr(pl, "Buffered"):
        try:
            return pl.BlockSpec(shape, index_map, pipeline_mode=pl.Buffered(buffers))
        except TypeError:
            pass
    return pl.BlockSpec(shape, index_map)


# ------------------------------ fused kernel ------------------------------

def _ffn_kernel(x_ref, w1_ref, b1_ref, w2_ref, b2_ref, o_ref, acc_ref):
    """One (row-tile, hidden-tile) step of GELU(x @ W1 + b1) @ W2 + b2.

    grid = (row_blocks, hidden_blocks). The hidden axis is the reduction axis
    of the second matmul; partial outputs accumulate in an f32 VMEM scratch.
    """
    hj = pl.program_id(1)

    @pl.when(hj == 0)
    def _():
        acc_ref[...] = jnp.zeros_like(acc_ref)

    # First matmul on the MXU (bf16 operands, f32 accumulation).
    h = jnp.dot(x_ref[...], w1_ref[...], preferred_element_type=jnp.float32)
    h = h + b1_ref[...]                                        # (tm, tH) f32
    # exact (erf-based) GELU, matching torch.nn.GELU() default
    h = 0.5 * h * (1.0 + lax.erf(h * _INV_SQRT2))
    # Second matmul; accumulate this hidden tile's contribution.
    acc_ref[...] += jnp.dot(h.astype(w2_ref.dtype), w2_ref[...],
                            preferred_element_type=jnp.float32)

    @pl.when(hj == pl.num_programs(1) - 1)
    def _():
        o_ref[...] = (acc_ref[...] + b2_ref[...]).astype(o_ref.dtype)


# ------------------------------ wrapper ------------------------------

def feedforward(x, w1, b1, w2, b2, *, block_m=512, max_hidden_tile=2048):
    """FeedForward forward pass (eval mode). x: (..., dim)."""
    orig_shape = x.shape
    out_dtype = x.dtype
    D = orig_shape[-1]
    H = w1.shape[1]
    x2 = x.reshape(-1, D)
    M = x2.shape[0]

    # --- row tile: large (amortize per-step overhead), but keep >=2 row blocks
    # when possible so both v7x TensorCores get work.
    if M <= 8:
        tm = 8
    elif M <= 2 * block_m:
        tm = min(block_m, _round_up(_cdiv(M, 2), 8))
    else:
        tm = block_m
    num_m = _cdiv(M, tm)  # ragged last block: Pallas masks the partial store

    # --- hidden tile: bound bf16 weight-block VMEM when D,H are large.
    tH = H
    if H > max_hidden_tile and 4 * D * H > (16 << 20):   # W1+W2 bf16 > 16 MiB
        cand = (min(max_hidden_tile, H) // 128) * 128
        while cand >= 128 and H % cand != 0:
            cand -= 128
        if cand >= 128:
            tH = cand
        # TODO(synk): if H has no lane-aligned divisor we keep the full H
        # (ragged hidden tiling would corrupt the accumulation).
    nH = H // tH

    # --- bf16 MXU operands; biases stay f32 for the f32 accumulation path.
    x_bf = x2.astype(jnp.bfloat16)
    w1_bf = w1.astype(jnp.bfloat16)
    w2_bf = w2.astype(jnp.bfloat16)
    b1_2d = b1.reshape(1, H).astype(jnp.float32)
    b2_2d = b2.reshape(1, D).astype(jnp.float32)

    # --- VMEM budget (bytes): tiles, weight blocks, scratch, temporaries.
    out_bytes = jnp.dtype(out_dtype).itemsize
    wbuf = 1 if nH == 1 else 2
    vmem_needed = (
        2 * tm * D * 2                    # x tile, bf16, double-buffered
        + 2 * tm * D * out_bytes          # out tile, double-buffered
        + wbuf * (D * tH + tH * D) * 2    # W1/W2 blocks, bf16
        + wbuf * tH * 4 + D * 4           # biases, f32
        + tm * D * 4                      # f32 accumulator scratch
        + 2 * tm * tH * 4                 # hidden intermediates, f32
    )
    try:
        vmem_cap = pltpu.get_tpu_info().vmem_capacity_bytes
    except Exception:
        vmem_cap = 64 << 20
    vmem_limit = int(min(max(vmem_needed + (2 << 20), 16 << 20),
                         int(vmem_cap * 0.75)))

    cost = pl.CostEstimate(
        flops=4 * M * D * H,
        transcendentals=M * H,
        bytes_accessed=(M * D * (2 + out_bytes)          # x in + y out
                        + num_m * (4 * D * H + 4 * H)    # weights/b1 per row block
                        + 4 * D),                        # b2
    )

    def _call(use_single_buffer):
        wb = 1 if (use_single_buffer and nH == 1) else None
        bb = 1 if use_single_buffer else None
        return pl.pallas_call(
            _ffn_kernel,
            out_shape=jax.ShapeDtypeStruct((M, D), out_dtype),
            grid=(num_m, nH),
            in_specs=[
                pl.BlockSpec((tm, D), lambda i, j: (i, 0)),              # x row tile
                _spec((D, tH), lambda i, j: (0, j), buffers=wb),         # W1 block
                _spec((1, tH), lambda i, j: (0, j), buffers=wb),         # b1 block
                _spec((tH, D), lambda i, j: (j, 0), buffers=wb),         # W2 block
                _spec((1, D), lambda i, j: (0, 0), buffers=bb),          # b2
            ],
            out_specs=pl.BlockSpec((tm, D), lambda i, j: (i, 0)),
            scratch_shapes=[pltpu.VMEM((tm, D), jnp.float32)],
            compiler_params=pltpu.CompilerParams(
                dimension_semantics=("parallel", "arbitrary"),
                vmem_limit_bytes=vmem_limit,
            ),
            cost_estimate=cost,
        )(x_bf, w1_bf, b1_2d, w2_bf, b2_2d)

    try:
        out = _call(True)
    except Exception:
        # Fallback: identical kernel with default (double) buffering, in case
        # this JAX build rejects pipeline_mode/Buffered(1) at lowering time.
        out = _call(False)

    return out.reshape(orig_shape)

# TODO(synk): nn.Dropout(p) is identity in eval mode (what we reproduce);
# training-mode dropout masks are not implemented.


# ------------------------------ reference ------------------------------

def feedforward_ref(x, w1, b1, w2, b2):
    h = jnp.dot(x, w1, precision=lax.Precision.HIGHEST) + b1
    h = 0.5 * h * (1.0 + lax.erf(h * _INV_SQRT2))
    return jnp.dot(h, w2, precision=lax.Precision.HIGHEST) + b2


# ------------------------------ main ------------------------------

if __name__ == "__main__":
    # Small shapes, lane-dense feature dims (multiples of 128).
    DIM, HIDDEN = 256, 512
    B, S = 2, 64

    key = jax.random.PRNGKey(0)
    kx, kw1, kb1, kw2, kb2 = jax.random.split(key, 5)
    x = jax.random.normal(kx, (B, S, DIM), jnp.float32)
    w1 = jax.random.normal(kw1, (DIM, HIDDEN), jnp.float32) * 0.02
    b1 = jax.random.normal(kb1, (HIDDEN,), jnp.float32) * 0.02
    w2 = jax.random.normal(kw2, (HIDDEN, DIM), jnp.float32) * 0.02
    b2 = jax.random.normal(kb2, (DIM,), jnp.float32) * 0.02

    out = jax.block_until_ready(feedforward(x, w1, b1, w2, b2))

    assert out.shape == (B, S, DIM), out.shape
    assert out.dtype == x.dtype, out.dtype
    assert bool(jnp.all(jnp.isfinite(out)))

    ref = feedforward_ref(x, w1, b1, w2, b2)
    max_err = float(jnp.max(jnp.abs(out - ref)))
    assert max_err < 1e-2, f"max abs error vs reference = {max_err}"

    print("KERNEL_OK")
</pallas_src>

<mosaic_0001>
module attributes {stable_mosaic.version = 11 : i64} {
  func.func @_ffn_kernel(%arg0: i32, %arg1: i32, %arg2: memref<64x256xbf16, #tpu.memory_space<vmem>>, %arg3: memref<256x512xbf16, #tpu.memory_space<vmem>>, %arg4: memref<1x512xf32, #tpu.memory_space<vmem>>, %arg5: memref<512x256xbf16, #tpu.memory_space<vmem>>, %arg6: memref<1x256xf32, #tpu.memory_space<vmem>>, %arg7: memref<64x256xf32, #tpu.memory_space<vmem>>, %arg8: memref<64x256xf32, #tpu.memory_space<vmem>>) attributes {dimension_semantics = [#tpu.dimension_semantics<parallel>, #tpu.dimension_semantics<arbitrary>], iteration_bounds = array<i64: 2, 1>, scalar_prefetch = 0 : i64, scratch_operands = 1 : i64, tpu.core_type = #tpu.core_type<tc>, window_params = [{transform_indices = @transform_0, window_bounds = array<i64: 64, 256>}, {pipeline_mode = #tpu.pipeline_mode<synchronous>, transform_indices = @transform_1, window_bounds = array<i64: 256, 512>}, {pipeline_mode = #tpu.pipeline_mode<synchronous>, transform_indices = @transform_2, window_bounds = array<i64: 1, 512>}, {pipeline_mode = #tpu.pipeline_mode<synchronous>, transform_indices = @transform_3, window_bounds = array<i64: 512, 256>}, {pipeline_mode = #tpu.pipeline_mode<synchronous>, transform_indices = @transform_4, window_bounds = array<i64: 1, 256>}, {transform_indices = @transform_5, window_bounds = array<i64: 64, 256>}]} {
    %c0_i32 = arith.constant 0 : i32
    %0 = arith.cmpi eq, %arg1, %c0_i32 : i32
    %1 = arith.extui %0 : i1 to i32
    %c0_i32_0 = arith.constant 0 : i32
    %2 = arith.cmpi ne, %1, %c0_i32_0 : i32
    scf.if %2 {
      %cst_18 = arith.constant 0.000000e+00 : f32
      %26 = vector.broadcast %cst_18 : f32 to vector<64x256xf32>
      %c0_19 = arith.constant 0 : index
      %c0_20 = arith.constant 0 : index
      %27 = vector.load %arg8[%c0_19, %c0_20] : memref<64x256xf32, #tpu.memory_space<vmem>>, vector<64x256xf32>
      tpu.vector_store %arg8[%c0_19, %c0_20], %26 {strides = array<i32>} : memref<64x256xf32, #tpu.memory_space<vmem>>, vector<64x256xf32>,
    } else {
    }
    %c0 = arith.constant 0 : index
    %c0_1 = arith.constant 0 : index
    %3 = vector.load %arg2[%c0, %c0_1] : memref<64x256xbf16, #tpu.memory_space<vmem>>, vector<64x256xbf16>
    %c0_2 = arith.constant 0 : index
    %c0_3 = arith.constant 0 : index
    %4 = vector.load %arg3[%c0_2, %c0_3] : memref<256x512xbf16, #tpu.memory_space<vmem>>, vector<256x512xbf16>
    %cst = arith.constant dense<0.000000e+00> : vector<64x512xf32>
    %5 = tpu.matmul %3, %4, %cst {dimension_numbers = #tpu.dot_dimension_numbers<[1], [0], [0], [1], [0, 0, 1, 1], [], []>} : vector<64x256xbf16>, vector<256x512xbf16>, vector<64x512xf32> -> vector<64x512xf32>
    %c0_4 = arith.constant 0 : index
    %c0_5 = arith.constant 0 : index
    %6 = vector.load %arg4[%c0_4, %c0_5] : memref<1x512xf32, #tpu.memory_space<vmem>>, vector<1x512xf32>
    %7 = vector.broadcast %6 : vector<1x512xf32> to vector<64x512xf32>
    %8 = arith.addf %5, %7 : vector<64x512xf32>
    %cst_6 = arith.constant 5.000000e-01 : f32
    %9 = vector.broadcast %cst_6 : f32 to vector<64x512xf32>
    %10 = arith.mulf %9, %8 : vector<64x512xf32>
    %cst_7 = arith.constant 0.707106769 : f32
    %11 = vector.broadcast %cst_7 : f32 to vector<64x512xf32>
    %12 = arith.mulf %8, %11 : vector<64x512xf32>
    %13 = math.erf %12 : vector<64x512xf32>
    %cst_8 = arith.constant 1.000000e+00 : f32
    %14 = vector.broadcast %cst_8 : f32 to vector<64x512xf32>
    %15 = arith.addf %14, %13 : vector<64x512xf32>
    %16 = arith.mulf %10, %15 : vector<64x512xf32>
    %c0_9 = arith.constant 0 : index
    %c0_10 = arith.constant 0 : index
    %17 = vector.load %arg8[%c0_9, %c0_10] : memref<64x256xf32, #tpu.memory_space<vmem>>, vector<64x256xf32>
    %18 = arith.truncf %16 : vector<64x512xf32> to vector<64x512xbf16>
    %c0_11 = arith.constant 0 : index
    %c0_12 = arith.constant 0 : index
    %19 = vector.load %arg5[%c0_11, %c0_12] : memref<512x256xbf16, #tpu.memory_space<vmem>>, vector<512x256xbf16>
    %cst_13 = arith.constant dense<0.000000e+00> : vector<64x256xf32>
    %20 = tpu.matmul %18, %19, %cst_13 {dimension_numbers = #tpu.dot_dimension_numbers<[1], [0], [0], [1], [0, 0, 1, 1], [], []>} : vector<64x512xbf16>, vector<512x256xbf16>, vector<64x256xf32> -> vector<64x256xf32>
    %21 = arith.addf %17, %20 : vector<64x256xf32>
    %c0_14 = arith.constant 0 : index
    %c0_15 = arith.constant 0 : index
    %22 = vector.load %arg8[%c0_14, %c0_15] : memref<64x256xf32, #tpu.memory_space<vmem>>, vector<64x256xf32>
    tpu.vector_store %arg8[%c0_14, %c0_15], %21 {strides = array<i32>} : memref<64x256xf32, #tpu.memory_space<vmem>>, vector<64x256xf32>,
    %c0_i32_16 = arith.constant 0 : i32
    %23 = arith.cmpi eq, %arg1, %c0_i32_16 : i32
    %24 = arith.extui %23 : i1 to i32
    %c0_i32_17 = arith.constant 0 : i32
    %25 = arith.cmpi ne, %24, %c0_i32_17 : i32
    scf.if %25 {
      %c0_18 = arith.constant 0 : index
      %c0_19 = arith.constant 0 : index
      %26 = vector.load %arg8[%c0_18, %c0_19] : memref<64x256xf32, #tpu.memory_space<vmem>>, vector<64x256xf32>
      %c0_20 = arith.constant 0 : index
      %c0_21 = arith.constant 0 : index
      %27 = vector.load %arg6[%c0_20, %c0_21] : memref<1x256xf32, #tpu.memory_space<vmem>>, vector<1x256xf32>
      %28 = vector.broadcast %27 : vector<1x256xf32> to vector<64x256xf32>
      %29 = arith.addf %26, %28 : vector<64x256xf32>
      %c0_22 = arith.constant 0 : index
      %c0_23 = arith.constant 0 : index
      %30 = vector.load %arg7[%c0_22, %c0_23] : memref<64x256xf32, #tpu.memory_space<vmem>>, vector<64x256xf32>
      tpu.vector_store %arg7[%c0_22, %c0_23], %29 {strides = array<i32>} : memref<64x256xf32, #tpu.memory_space<vmem>>, vector<64x256xf32>,
    } else {
    }
    return
  }
  func.func @transform_0(%arg0: i32, %arg1: i32) -> (i32, i32) {
    %c0_i32 = arith.constant 0 : i32
    %c0_i32_0 = arith.constant 0 : i32
    return %arg0, %c0_i32 : i32, i32
  }
  func.func @transform_1(%arg0: i32, %arg1: i32) -> (i32, i32) {
    %c0_i32 = arith.constant 0 : i32
    %c0_i32_0 = arith.constant 0 : i32
    return %c0_i32, %arg1 : i32, i32
  }
  func.func @transform_2(%arg0: i32, %arg1: i32) -> (i32, i32) {
    %c0_i32 = arith.constant 0 : i32
    %c0_i32_0 = arith.constant 0 : i32
    return %c0_i32, %arg1 : i32, i32
  }
  func.func @transform_3(%arg0: i32, %arg1: i32) -> (i32, i32) {
    %c0_i32 = arith.constant 0 : i32
    %c0_i32_0 = arith.constant 0 : i32
    return %arg1, %c0_i32 : i32, i32
  }
  func.func @transform_4(%arg0: i32, %arg1: i32) -> (i32, i32) {
    %c0_i32 = arith.constant 0 : i32
    %c0_i32_0 = arith.constant 0 : i32
    %c0_i32_1 = arith.constant 0 : i32
    return %c0_i32, %c0_i32_0 : i32, i32
  }
  func.func @transform_5(%arg0: i32, %arg1: i32) -> (i32, i32) {
    %c0_i32 = arith.constant 0 : i32
    %c0_i32_0 = arith.constant 0 : i32
    return %arg0, %c0_i32 : i32, i32
  }
}

module attributes {stable_mosaic.version = 11 : i64} {
  func.func @_ffn_kernel(%arg0: i32, %arg1: i32, %arg2: memref<64x256xbf16, #tpu.memory_space<vmem>>, %arg3: memref<256x512xbf16, #tpu.memory_space<vmem>>, %arg4: memref<1x512xf32, #tpu.memory_space<vmem>>, %arg5: memref<512x256xbf16, #tpu.memory_space<vmem>>, %arg6: memref<1x256xf32, #tpu.memory_space<vmem>>, %arg7: memref<64x256xf32, #tpu.memory_space<vmem>>, %arg8: memref<64x256xf32, #tpu.memory_space<vmem>>) attributes {dimension_semantics = [#tpu.dimension_semantics<parallel>, #tpu.dimension_semantics<arbitrary>], iteration_bounds = array<i64: 2, 1>, scalar_prefetch = 0 : i64, scratch_operands = 1 : i64, tpu.core_type = #tpu.core_type<tc>, window_params = [{transform_indices = @transform_0, window_bounds = array<i64: 64, 256>}, {transform_indices = @transform_1, window_bounds = array<i64: 256, 512>}, {transform_indices = @transform_2, window_bounds = array<i64: 1, 512>}, {transform_indices = @transform_3, window_bounds = array<i64: 512, 256>}, {pipeline_mode = #tpu.pipeline_mode<synchronous>, transform_indices = @transform_4, window_bounds = array<i64: 1, 256>}, {transform_indices = @transform_5, window_bounds = array<i64: 64, 256>}]} {
    %c0_i32 = arith.constant 0 : i32
    %0 = arith.cmpi eq, %arg1, %c0_i32 : i32
    %1 = arith.extui %0 : i1 to i32
    %c0_i32_0 = arith.constant 0 : i32
    %2 = arith.cmpi ne, %1, %c0_i32_0 : i32
    scf.if %2 {
      %cst_18 = arith.constant 0.000000e+00 : f32
      %26 = vector.broadcast %cst_18 : f32 to vector<64x256xf32>
      %c0_19 = arith.constant 0 : index
      %c0_20 = arith.constant 0 : index
      %27 = vector.load %arg8[%c0_19, %c0_20] : memref<64x256xf32, #tpu.memory_space<vmem>>, vector<64x256xf32>
      tpu.vector_store %arg8[%c0_19, %c0_20], %26 {strides = array<i32>} : memref<64x256xf32, #tpu.memory_space<vmem>>, vector<64x256xf32>,
    } else {
    }
    %c0 = arith.constant 0 : index
    %c0_1 = arith.constant 0 : index
    %3 = vector.load %arg2[%c0, %c0_1] : memref<64x256xbf16, #tpu.memory_space<vmem>>, vector<64x256xbf16>
    %c0_2 = arith.constant 0 : index
    %c0_3 = arith.constant 0 : index
    %4 = vector.load %arg3[%c0_2, %c0_3] : memref<256x512xbf16, #tpu.memory_space<vmem>>, vector<256x512xbf16>
    %cst = arith.constant dense<0.000000e+00> : vector<64x512xf32>
    %5 = tpu.matmul %3, %4, %cst {dimension_numbers = #tpu.dot_dimension_numbers<[1], [0], [0], [1], [0, 0, 1, 1], [], []>} : vector<64x256xbf16>, vector<256x512xbf16>, vector<64x512xf32> -> vector<64x512xf32>
    %c0_4 = arith.constant 0 : index
    %c0_5 = arith.constant 0 : index
    %6 = vector.load %arg4[%c0_4, %c0_5] : memref<1x512xf32, #tpu.memory_space<vmem>>, vector<1x512xf32>
    %7 = vector.broadcast %6 : vector<1x512xf32> to vector<64x512xf32>
    %8 = arith.addf %5, %7 : vector<64x512xf32>
    %cst_6 = arith.constant 5.000000e-01 : f32
    %9 = vector.broadcast %cst_6 : f32 to vector<64x512xf32>
    %10 = arith.mulf %9, %8 : vector<64x512xf32>
    %cst_7 = arith.constant 0.707106769 : f32
    %11 = vector.broadcast %cst_7 : f32 to vector<64x512xf32>
    %12 = arith.mulf %8, %11 : vector<64x512xf32>
    %13 = math.erf %12 : vector<64x512xf32>
    %cst_8 = arith.constant 1.000000e+00 : f32
    %14 = vector.broadcast %cst_8 : f32 to vector<64x512xf32>
    %15 = arith.addf %14, %13 : vector<64x512xf32>
    %16 = arith.mulf %10, %15 : vector<64x512xf32>
    %c0_9 = arith.constant 0 : index
    %c0_10 = arith.constant 0 : index
    %17 = vector.load %arg8[%c0_9, %c0_10] : memref<64x256xf32, #tpu.memory_space<vmem>>, vector<64x256xf32>
    %18 = arith.truncf %16 : vector<64x512xf32> to vector<64x512xbf16>
    %c0_11 = arith.constant 0 : index
    %c0_12 = arith.constant 0 : index
    %19 = vector.load %arg5[%c0_11, %c0_12] : memref<512x256xbf16, #tpu.memory_space<vmem>>, vector<512x256xbf16>
    %cst_13 = arith.constant dense<0.000000e+00> : vector<64x256xf32>
    %20 = tpu.matmul %18, %19, %cst_13 {dimension_numbers = #tpu.dot_dimension_numbers<[1], [0], [0], [1], [0, 0, 1, 1], [], []>} : vector<64x512xbf16>, vector<512x256xbf16>, vector<64x256xf32> -> vector<64x256xf32>
    %21 = arith.addf %17, %20 : vector<64x256xf32>
    %c0_14 = arith.constant 0 : index
    %c0_15 = arith.constant 0 : index
    %22 = vector.load %arg8[%c0_14, %c0_15] : memref<64x256xf32, #tpu.memory_space<vmem>>, vector<64x256xf32>
    tpu.vector_store %arg8[%c0_14, %c0_15], %21 {strides = array<i32>} : memref<64x256xf32, #tpu.memory_space<vmem>>, vector<64x256xf32>,
    %c0_i32_16 = arith.constant 0 : i32
    %23 = arith.cmpi eq, %arg1, %c0_i32_16 : i32
    %24 = arith.extui %23 : i1 to i32
    %c0_i32_17 = arith.constant 0 : i32
    %25 = arith.cmpi ne, %24, %c0_i32_17 : i32
    scf.if %25 {
      %c0_18 = arith.constant 0 : index
      %c0_19 = arith.constant 0 : index
      %26 = vector.load %arg8[%c0_18, %c0_19] : memref<64x256xf32, #tpu.memory_space<vmem>>, vector<64x256xf32>
      %c0_20 = arith.constant 0 : index
      %c0_21 = arith.constant 0 : index
      %27 = vector.load %arg6[%c0_20, %c0_21] : memref<1x256xf32, #tpu.memory_space<vmem>>, vector<1x256xf32>
      %28 = vector.broadcast %27 : vector<1x256xf32> to vector<64x256xf32>
      %29 = arith.addf %26, %28 : vector<64x256xf32>
      %c0_22 = arith.constant 0 : index
      %c0_23 = arith.constant 0 : index
      %30 = vector.load %arg7[%c0_22, %c0_23] : memref<64x256xf32, #tpu.memory_space<vmem>>, vector<64x256xf32>
      tpu.vector_store %arg7[%c0_22, %c0_23], %29 {strides = array<i32>} : memref<64x256xf32, #tpu.memory_space<vmem>>, vector<64x256xf32>,
    } else {
    }
    return
  }
  func.func @transform_0(%arg0: i32, %arg1: i32) -> (i32, i32) {
    %c0_i32 = arith.constant 0 : i32
    %c0_i32_0 = arith.constant 0 : i32
    return %arg0, %c0_i32 : i32, i32
  }
  func.func @transform_1(%arg0: i32, %arg1: i32) -> (i32, i32) {
    %c0_i32 = arith.constant 0 : i32
    %c0_i32_0 = arith.constant 0 : i32
    return %c0_i32, %arg1 : i32, i32
  }
  func.func @transform_2(%arg0: i32, %arg1: i32) -> (i32, i32) {
    %c0_i32 = arith.constant 0 : i32
    %c0_i32_0 = arith.constant 0 : i32
    return %c0_i32, %arg1 : i32, i32
  }
  func.func @transform_3(%arg0: i32, %arg1: i32) -> (i32, i32) {
    %c0_i32 = arith.constant 0 : i32
    %c0_i32_0 = arith.constant 0 : i32
    return %arg1, %c0_i32 : i32, i32
  }
  func.func @transform_4(%arg0: i32, %arg1: i32) -> (i32, i32) {
    %c0_i32 = arith.constant 0 : i32
    %c0_i32_0 = arith.constant 0 : i32
    %c0_i32_1 = arith.constant 0 : i32
    return %c0_i32, %c0_i32_0 : i32, i32
  }
  func.func @transform_5(%arg0: i32, %arg1: i32) -> (i32, i32) {
    %c0_i32 = arith.constant 0 : i32
    %c0_i32_0 = arith.constant 0 : i32
    return %arg0, %c0_i32 : i32, i32
  }
}

</mosaic_0001>

<bundles_post_ra>
// kernel: tpu_custom_call.1
= control target key start
LH: loop header
LB: loop body
LE: loop exit
PB: predicated region body
PF: predicated region fallthrough
CT: control target
= control target key end

     0   :  { %10 = vsyncpa [#allocation4], 0  ;;  %s3059_s0 = inlined_call_operand.hbm [shape: bf16[128,256], index: 0, kind: input, shape index: {}]   ;;  %s3060_s1 = inlined_call_operand.hbm [shape: bf16[256,512], index: 1, kind: input, shape index: {}]   ;;  %s3061_s2 = inlined_call_operand.vmem [shape: f32[1,512], index: 2, kind: input, shape index: {}]   ;;  %s3062_s3 = inlined_call_operand.hbm [shape: bf16[512,256], index: 3, kind: input, shape index: {}]   ;;  %s3063_s4 = inlined_call_operand.vmem [shape: f32[1,256], index: 4, kind: input, shape index: {}]   ;;  %s3064_s5 = inlined_call_operand.hbm [shape: f32[128,256], index: 5, kind: output, shape index: {}]  }
   0x1   :  { %12 = vsyncpa [#allocation4 + $0x1], 0 }
   0x2   :  { %13 = vsyncpa [#allocation7], 0 }
   0x3   :  { %14 = vsyncpa [#allocation5], 0 }
   0x4   :  { %16 = vsyncpa [#allocation5 + $0x1], 0  ;;  %s2642_s18 = smov 0   ;;  %s2644_s19 = smov 0  }
   0x5   :  { %s2646_s20 = smov 0   ;;  %s2648_s21 = smov 0  }
   0x6   :  { %s2650_s22 = smov 0   ;;  %s2652_s23 = smov 0  }
   0x7 LB: > { %s1893_s24 = sadd.s32 4294967295, %s2600_s23   ;;  %s1894_s25 = sadd.s32 4294967294, %s2600_s23   ;;  %s2600_s23 = sphi %s2652_s23, %s22_s23   ;;  %s2596_s22 = sphi %s2650_s22, %s3088_s22   ;;  %s2592_s21 = sphi %s2648_s21, %s3087_s21   ;;  %s2588_s20 = sphi %s2646_s20, %s3086_s20   ;;  %s2584_s19 = sphi %s2644_s19, %s3085_s19   ;;  %s2580_s18 = sphi %s2642_s18, %s3084_s18  }
   0x8   : > { %p54_p0 = scmp.ne.s32.totalorder %s2584_s19, %s2580_s18  ;;  %p2676_p1 = scmp.eq.s32.totalorder %s1893_s24, 0 }
   0x9   : > { %p2680_p2 = scmp.eq.s32.totalorder %s1893_s24, 1  ;;  %p183_p3 = scmp.eq.s32.totalorder %s1894_s25, 1 }
   0xa   : > { %s3070_s26 = scalar_select %p2676_p1, 1, 0 }
   0xb   : > { %p2686_p4 = por %p2676_p1, %p54_p0  ;;  %p1895_p5 = scmp.ge.s32.totalorder %s2600_s23, 1 }
   0xc   : > { %p2691_p6 = por %p183_p3, %p54_p0  ;;  %p190_p7 = scmp.lt.s32.totalorder %s2600_s23, 3 }
   0xd   : > { %s3072_s28 = scalar_select %p2686_p4, 1, 0 }
   0xe   : > { %s3073_s29 = scalar_select %p2691_p6, 1, 0 }
   0xf   : > { %p2696_p8 = pnand %p1895_p5, %p190_p7  ;;  %s2602_s6 = smov [#allocation6]  }
  0x10   : > { %s205_s7 = sshll.u32 %s2602_s6, 4  ;;  %s2603_s9 = smov [#allocation8]   ;;  %s2700_s7 = int_to_ptr.vmem [resolvable:$true] %s205_s7 }
  0x11   : > { %p2083_p9 = pneg %p2696_p8  ;;  %s230_s10 = sshll.u32 %s2603_s9, 4  ;;  %s2711_s10 = int_to_ptr.vmem [resolvable:$true] %s230_s10 }
  0x12   : > { %s2428_s13 = scalar_lea.hbm %s3060_s1, 8192 }
  0x13   : > { %p2707_p11 = pnand %p2083_p9, %p2676_p1  ;;  %p2429_p12 = scmp.ne.s32.totalorder %s3060_s1, %s2428_s13 }
  0x14   : > { %p2435_p5 = scmp.lt.u32.totalorder %s2428_s13, %s3060_s1 }
  0x15   : > { %p2430_p13 = pneg %p2707_p11 }
  0x17   : > { %p2431_p0 = pnand %p2430_p13, %p2429_p12 }
  0x19   : > { %p2432_p3 = pneg %p2431_p0 }
  0x1b   : > { %p2437_p7 = pnand %p2435_p5, %p2432_p3 }
  0x1d   : > { %2440 = shalt.err (!%p2437_p7)
}
  0x1e   : > { %s2441_s24 = scalar_lea.vmem %s2700_s7, 8192  ;;  %p2449_p1 = scmp.lt.s32.totalorder %s2700_s7, %s2700_s7 }
  0x1f   : > { %p2442_p9 = scmp.ne.s32.totalorder %s2700_s7, %s2441_s24  ;;  %p2450_p12 = scmp.lt.s32.totalorder %s2441_s24, %s2441_s24 }
  0x21   : > { %p2444_p10 = pnand %p2442_p9, %p2430_p13  ;;  %p2451_p0 = por %p2450_p12, %p2449_p1 }
  0x23   : > { %p2445_p6 = pneg %p2444_p10 }
  0x25   : > { %p2452_p4 = pnand %p2451_p0, %p2445_p6 }
  0x27   : > { %2455 = shalt.err (!%p2452_p4)
}
  0x28   : > { %s2604_s25 = smov 256   ;;  %s2605_s6 = smov 16  }
  0x29   : > { %2086 = dma.hbm_to_vmem [thread:$0]  (!%p2707_p11), %s3060_s1, 8192, %s2700_s7, [#allocation7], %s2604_s25, %s2604_s25, %s2605_s6  }
  0x2a   : > { %s2456_s14 = scalar_lea.hbm %s3062_s3, 8192 }
  0x2b   : > { %p2457_p1 = scmp.ne.s32.totalorder %s3062_s3, %s2456_s14  ;;  %p2463_p10 = scmp.lt.u32.totalorder %s2456_s14, %s3062_s3 }
  0x2d   : > { %p2459_p4 = pnand %p2457_p1, %p2430_p13 }
  0x2f   : > { %p2460_p6 = pneg %p2459_p4 }
  0x31   : > { %p2465_p3 = pnand %p2463_p10, %p2460_p6 }
  0x33   : > { %2468 = shalt.err (!%p2465_p3)
}
  0x34   : > { %s2469_s7 = scalar_lea.vmem %s2711_s10, 8192  ;;  %p2477_p12 = scmp.lt.s32.totalorder %s2711_s10, %s2711_s10 }
  0x35   : > { %p2470_p5 = scmp.ne.s32.totalorder %s2711_s10, %s2469_s7  ;;  %p2478_p0 = scmp.lt.s32.totalorder %s2469_s7, %s2469_s7 }
  0x37   : > { %p2472_p7 = pnand %p2470_p5, %p2430_p13  ;;  %p2479_p1 = por %p2478_p0, %p2477_p12 }
  0x39   : > { %p2473_p9 = pneg %p2472_p7 }
  0x3b   : > { %p2480_p4 = pnand %p2479_p1, %p2473_p9 }
  0x3d   : > { %2483 = shalt.err (!%p2480_p4)
}
  0x3e   : > { %s3068_s25 = smov 128   ;;  %s2607_s6 = smov 8  }
  0x3f   : > { %2089 = dma.hbm_to_vmem [thread:$0]  (!%p2707_p11), %s3062_s3, 8192, %s2711_s10, [#allocation7], %s3068_s25, %s3068_s25, %s2607_s6  }
  0x40   : > { %s34_s12 = sadd.s32 1, %s2596_s22  ;;  %s41_s13 = sadd.s32 1, %s2588_s20 }
  0x41   : > { %p36_p13 = scmp.ge.s32.totalorder %s34_s12, 2  ;;  %p48_p6 = scmp.ne.s32.totalorder %s2588_s20, %s2584_s19 }
  0x42   : > { %p49_p10 = scmp.eq.s32.totalorder %s2600_s23, 0  ;;  %p2100_p3 = scmp.lt.s32.totalorder %s2600_s23, 2 }
  0x43   : > { %s3090_s12 = smov (%p36_p13, %s34_s12), 0  ;;  %p2778_p7 = por %p2680_p2, %p48_p6 }
  0x44   : > { %p50_p5 = por %p49_p10, %p48_p6  ;;  %s38_s14 = ssub.s32 %s2596_s22, %s3090_s12 }
  0x45   : > { %s3076_s8 = scalar_select %p2778_p7, 1, 0 }
  0x46   : > { %s247_s15 = sand.u32 1, %s2588_s20   ;;  %p39_p9 = scmp.eq.s32.totalorder %s38_s14, 0 }
  0x47   : > { %s1900_s10 = sshll.u32 %s247_s15, 6  ;;  %s2052_s16 = sshll.u32 %s2596_s22, 10 }
  0x48   : > { %s2787_s17 = scalar_select %p39_p9, %s2588_s20, %s41_s13  }
  0x49   : > { %s2792_s9 = scalar_lea.hbm %s3059_s0, %s2052_s16  ;;  %s251_s27 = scalar_lea.vmem [#allocation3], %s1900_s10 }
  0x4a   : > { %s259_s11 = sshll.u32 %s251_s27, 4  ;;  %p2796_p2 = pnand %p2100_p3, %p50_p5  ;;  %s2800_s11 = int_to_ptr.vmem [resolvable:$true] %s259_s11 }
  0x4b   : > { %s2802_s13 = scalar_lea.sflag [#allocation4], %s247_s15  ;;  %s2484_s14 = scalar_lea.hbm %s2792_s9, 1024 }
  0x4c   : > { %p2485_p11 = scmp.ne.s32.totalorder %s2792_s9, %s2484_s14  ;;  %p2486_p12 = pneg %p2796_p2 }
  0x4d   : > { %s2489_s24 = scalar_lea.hbm %s3059_s0, 2048  ;;  %p2490_p4 = scmp.lt.u32.totalorder %s2792_s9, %s3059_s0 }
  0x4e   : > { %p2487_p0 = pnand %p2486_p12, %p2485_p11  ;;  %p2491_p13 = scmp.lt.u32.totalorder %s2489_s24, %s2484_s14 }
  0x4f   : > { %p2493_p10 = scmp.lt.u32.totalorder %s2484_s14, %s2792_s9 }
  0x50   : > { %p2488_p1 = pneg %p2487_p0  ;;  %p2492_p6 = por %p2491_p13, %p2490_p4 }
  0x52   : > { %p2494_p3 = por %p2493_p10, %p2492_p6 }
  0x54   : > { %p2495_p5 = pnand %p2494_p3, %p2488_p1 }
  0x56   : > { %2498 = shalt.err (!%p2495_p5)
}
  0x57   : > { %s2499_s15 = scalar_lea.vmem %s2800_s11, 1024  ;;  %s2608_s10 = smov [#allocation3]  }
  0x58   : > { %p2500_p9 = scmp.ne.s32.totalorder %s2800_s11, %s2499_s15  ;;  %s2504_s16 = sshll.u32 %s2608_s10, 4  ;;  %s2505_s16 = int_to_ptr.vmem [resolvable:$false] %s2504_s16 }
  0x59   : > { %s2506_s7 = scalar_lea.vmem %s2505_s16, 2048  ;;  %p2507_p7 = scmp.lt.s32.totalorder %s2800_s11, %s2505_s16 }
  0x5a   : > { %p2502_p11 = pnand %p2500_p9, %p2486_p12  ;;  %p2508_p4 = scmp.lt.s32.totalorder %s2506_s7, %s2499_s15 }
  0x5c   : > { %p2503_p0 = pneg %p2502_p11  ;;  %p2509_p13 = por %p2508_p4, %p2507_p7 }
  0x5e   : > { %p2510_p6 = pnand %p2509_p13, %p2503_p0 }
  0x60   : > { %2513 = shalt.err (!%p2510_p6)
}
  0x61   : > { %s3078_s14 = smov 128   ;;  %271 = sbr.rel (%p2696_p8) target bundleno = 730 (0x2da), region = 40 }
  0x62   : > { %2093 = dma.hbm_to_vmem [thread:$0]  (!%p2796_p2), %s2792_s9, 1024, %s2800_s11, %s2802_s13, %s3078_s14, %s3078_s14, %s2607_s6  }
  0x63   : > { %s2836_s24 = sand.u32 (!%p2696_p8), 1, %s2584_s19   ;;  %p3079_p7 = scmp.ne.s32.totalorder (!%p2696_p8), %s3072_s28, 0 }
  0x64   : > { %s1905_s27 = sshll.u32 (!%p2696_p8), %s2836_s24, 6  ;;  %s274_s15 = scalar_lea.sflag (!%p2696_p8), [#allocation4], %s2836_s24 }
  0x65   : > { %s2840_s10 = scalar_lea.vmem (!%p2696_p8), [#allocation3], %s1905_s27 }
  0x68   : > { %2567 = dma.done.wait (%p3079_p7), %s274_s15, 1024  }
  0x69   : > { %2569 = vsyncadd (%p3079_p7), %s274_s15, 4294966272  ;;  %p3080_p2 = scmp.ne.s32.totalorder %s3070_s26, 0 }
  0x6b   : > { %2571 = dma.done.wait (%p3080_p2), [#allocation7], 16384  }
  0x6c   : > { %2573 = vsyncadd (%p3080_p2), [#allocation7], 4294950912  ;;  %v2160_v0 = vld [vmem:[#allocation6 + $0x4] ss:$16 sps:$4 sm:$0xff]   ;;  %v2162_v1 = vld [vmem:[#allocation6] ss:$16 sps:$4 sm:$0xff]  }
  0x6d   : > { %799 = vmatprep.subr.bf16.mxu1 %v2160_v0  ;;  %v2163_v2 = vld [vmem:[#allocation6 + $0x24] ss:$16 sps:$4 sm:$0xff]   ;;  %v2165_v3 = vld [vmem:[#allocation6 + $0x20] ss:$16 sps:$4 sm:$0xff]   ;;  %v2213_v40 = vld [vmem:[#allocation6 + $0xc] ss:$16 sps:$4 sm:$0xff]  }
  0x6e   : > { %800 = vmatpush1.bf16.msra.mxu1 %v2162_v1  ;;  %v2166_v4 = vld [vmem:[#allocation6 + $0x44] ss:$16 sps:$4 sm:$0xff]   ;;  %v2168_v5 = vld [vmem:[#allocation6 + $0x40] ss:$16 sps:$4 sm:$0xff]   ;;  %v2211_v44 = vld [vmem:[#allocation6 + $0x8] ss:$16 sps:$4 sm:$0xff]  }
  0x6f   : > { %801 = vmatprep.subr.bf16.mxu1 %v2163_v2  ;;  %v2169_v6 = vld [vmem:[#allocation6 + $0x64] ss:$16 sps:$4 sm:$0xff]   ;;  %v2171_v7 = vld [vmem:[#allocation6 + $0x60] ss:$16 sps:$4 sm:$0xff]   ;;  %v2216_v46 = vld [vmem:[#allocation6 + $0x2c] ss:$16 sps:$4 sm:$0xff]  }
  0x70   : > { %v2172_v8 = vld [vmem:[#allocation6 + $0x84] ss:$16 sps:$4 sm:$0xff]   ;;  %v2174_v9 = vld [vmem:[#allocation6 + $0x80] ss:$16 sps:$4 sm:$0xff]   ;;  %v2214_v49 = vld [vmem:[#allocation6 + $0x28] ss:$16 sps:$4 sm:$0xff]  }
  0x71   : > { %v2175_v10 = vld [vmem:[#allocation6 + $0xa4] ss:$16 sps:$4 sm:$0xff]   ;;  %v2177_v11 = vld [vmem:[#allocation6 + $0xa0] ss:$16 sps:$4 sm:$0xff]   ;;  %v2219_v50 = vld [vmem:[#allocation6 + $0x4c] ss:$16 sps:$4 sm:$0xff]  }
  0x72   : > { %802 = vmatpush1.bf16.msra.mxu1 %v2165_v3  ;;  %v2178_v12 = vld [vmem:[#allocation6 + $0xc4] ss:$16 sps:$4 sm:$0xff]   ;;  %v2180_v14 = vld [vmem:[#allocation6 + $0xc0] ss:$16 sps:$4 sm:$0xff]   ;;  %v2217_v54 = vld [vmem:[#allocation6 + $0x48] ss:$16 sps:$4 sm:$0xff]  }
  0x73   : > { %803 = vmatprep.subr.bf16.mxu1 %v2166_v4  ;;  %v2851_v13 = vld [vmem:[%s2840_s10 + $0x4] ss:$8 sps:$4 sm:$0xff]   ;;  %v2183_v16 = vld [vmem:[#allocation6 + $0xe0] ss:$16 sps:$4 sm:$0xff]   ;;  %v2271_v31 = vld [vmem:[#allocation8 + $0x14] ss:$8 sps:$4 sm:$0xff]  }
  0x74   : > { %v2181_v15 = vld [vmem:[#allocation6 + $0xe4] ss:$16 sps:$4 sm:$0xff]   ;;  %831 = vmatprep.mubr.bf16.mxu1 %v2851_v13  ;;  %v2186_v18 = vld [vmem:[#allocation6 + $0x100] ss:$16 sps:$4 sm:$0xff]   ;;  %v2222_v56 = vld [vmem:[#allocation6 + $0x6c] ss:$16 sps:$4 sm:$0xff]  }
  0x75   : > { %v2184_v17 = vld [vmem:[#allocation6 + $0x104] ss:$16 sps:$4 sm:$0xff]   ;;  %v2189_v20 = vld [vmem:[#allocation6 + $0x120] ss:$16 sps:$4 sm:$0xff]   ;;  %v2220_v59 = vld [vmem:[#allocation6 + $0x68] ss:$16 sps:$4 sm:$0xff]  }
  0x76   : > { %804 = vmatpush1.bf16.msra.mxu1 %v2168_v5  ;;  %v2187_v19 = vld [vmem:[#allocation6 + $0x124] ss:$16 sps:$4 sm:$0xff]   ;;  %v2192_v22 = vld [vmem:[#allocation6 + $0x140] ss:$16 sps:$4 sm:$0xff]   ;;  %v2225_v60 = vld [vmem:[#allocation6 + $0x8c] ss:$16 sps:$4 sm:$0xff]  }
  0x77   : > { %805 = vmatprep.subr.bf16.mxu1 %v2169_v6  ;;  %v2190_v21 = vld [vmem:[#allocation6 + $0x144] ss:$16 sps:$4 sm:$0xff]   ;;  %v2195_v24 = vld [vmem:[#allocation6 + $0x160] ss:$16 sps:$4 sm:$0xff]   ;;  %v2223_v0 = vld [vmem:[#allocation6 + $0x88] ss:$16 sps:$4 sm:$0xff]  }
  0x78   : > { %v2193_v23 = vld [vmem:[#allocation6 + $0x164] ss:$16 sps:$4 sm:$0xff]   ;;  %v2198_v26 = vld [vmem:[#allocation6 + $0x180] ss:$16 sps:$4 sm:$0xff]   ;;  %v2228_v2 = vld [vmem:[#allocation6 + $0xac] ss:$16 sps:$4 sm:$0xff]  }
  0x79   : > { %v2196_v25 = vld [vmem:[#allocation6 + $0x184] ss:$16 sps:$4 sm:$0xff]   ;;  %v2270_v29 = vld [vmem:[#allocation8] ss:$8 sps:$4 sm:$0xff]   ;;  %v2273_v33 = vld [vmem:[#allocation8 + $0x10] ss:$8 sps:$4 sm:$0xff]  }
  0x7a   : > { %806 = vmatpush1.bf16.msra.mxu1 %v2171_v7  ;;  %v2199_v27 = vld [vmem:[#allocation6 + $0x1a4] ss:$16 sps:$4 sm:$0xff]   ;;  %v2201_v30 = vld [vmem:[#allocation6 + $0x1a0] ss:$16 sps:$4 sm:$0xff]   ;;  %v2226_v5 = vld [vmem:[#allocation6 + $0xa8] ss:$16 sps:$4 sm:$0xff]  }
  0x7b   : > { %807 = vmatprep.subr.bf16.mxu1 %v2172_v8  ;;  %v2268_v28 = vld [vmem:[#allocation8 + $0x4] ss:$8 sps:$4 sm:$0xff]   ;;  %v2204_v35 = vld [vmem:[#allocation6 + $0x1c0] ss:$16 sps:$4 sm:$0xff]   ;;  %v2277_v38 = vld [vmem:[#allocation8 + $0x34] ss:$8 sps:$4 sm:$0xff]  }
  0x7c   : > { %1521 = vmatprep.subr.bf16.mxu0 %v2268_v28  ;;  %v2202_v32 = vld [vmem:[#allocation6 + $0x1c4] ss:$16 sps:$4 sm:$0xff]   ;;  %v2276_v37 = vld [vmem:[#allocation8 + $0x20] ss:$8 sps:$4 sm:$0xff]   ;;  %v2279_v41 = vld [vmem:[#allocation8 + $0x30] ss:$8 sps:$4 sm:$0xff]  }
  0x7d   : > { %1522 = vmatpush1.bf16.msra.mxu0 %v2270_v29  ;;  %v2274_v34 = vld [vmem:[#allocation8 + $0x24] ss:$8 sps:$4 sm:$0xff]   ;;  %v2207_v39 = vld [vmem:[#allocation6 + $0x1e0] ss:$16 sps:$4 sm:$0xff]   ;;  %v2858_v45 = vld [vmem:[%s2840_s10 + $0x14] ss:$8 sps:$4 sm:$0xff]  }
  0x7e   : > { %808 = vmatpush1.bf16.msra.mxu1 %v2174_v9  ;;  %1523 = vmatprep.subr.bf16.mxu0 %v2271_v31  ;;  %v2205_v36 = vld [vmem:[#allocation6 + $0x1e4] ss:$16 sps:$4 sm:$0xff]   ;;  %v2855_v42 = vld [vmem:[%s2840_s10] ss:$8 sps:$4 sm:$0xff]   ;;  %v2285_v51 = vld [vmem:[#allocation8 + $0x50] ss:$8 sps:$4 sm:$0xff]  }
  0x7f   : > { %809 = vmatprep.subr.bf16.mxu1 %v2175_v10  ;;  %v2280_v43 = vld [vmem:[#allocation8 + $0x44] ss:$8 sps:$4 sm:$0xff]   ;;  %v2282_v47 = vld [vmem:[#allocation8 + $0x40] ss:$8 sps:$4 sm:$0xff]   ;;  %v2283_v48 = vld [vmem:[#allocation8 + $0x54] ss:$8 sps:$4 sm:$0xff]  }
  0x80   : > { %v2286_v52 = vld [vmem:[#allocation8 + $0x64] ss:$8 sps:$4 sm:$0xff]   ;;  %v2863_v53 = vld [vmem:[%s2840_s10 + $0x10] ss:$8 sps:$4 sm:$0xff]   ;;  %v2288_v57 = vld [vmem:[#allocation8 + $0x60] ss:$8 sps:$4 sm:$0xff]  }
  0x81   : > { %1524 = vmatpush1.bf16.msra.mxu0 %v2273_v33  ;;  %v2866_v55 = vld [vmem:[%s2840_s10 + $0x24] ss:$8 sps:$4 sm:$0xff]   ;;  %v2289_v58 = vld [vmem:[#allocation8 + $0x74] ss:$8 sps:$4 sm:$0xff]   ;;  %v2291_v61 = vld [vmem:[#allocation8 + $0x70] ss:$8 sps:$4 sm:$0xff]  }
  0x82   : > { %810 = vmatpush1.bf16.msra.mxu1 %v2177_v11  ;;  %1525 = vmatprep.subr.bf16.mxu0 %v2274_v34  ;;  %v2292_v62 = vld [vmem:[#allocation8 + $0x84] ss:$8 sps:$4 sm:$0xff]   ;;  %v2871_v63 = vld [vmem:[%s2840_s10 + $0x20] ss:$8 sps:$4 sm:$0xff]   ;;  %v2874_v1 = vld [vmem:[%s2840_s10 + $0x34] ss:$8 sps:$4 sm:$0xff]  }
  0x83   : > { %811 = vmatprep.subr.bf16.mxu1 %v2178_v12  ;;  %v2294_v3 = vld [vmem:[#allocation8 + $0x80] ss:$8 sps:$4 sm:$0xff]   ;;  %v2295_v4 = vld [vmem:[#allocation8 + $0x94] ss:$8 sps:$4 sm:$0xff]   ;;  %v2297_v7 = vld [vmem:[#allocation8 + $0x90] ss:$8 sps:$4 sm:$0xff]  }
  0x84   : > { %v2234_v6 = vld [vmem:[#allocation6 + $0xcc] ss:$16 sps:$4 sm:$0xff]   ;;  %v2249_v8 = vld [vmem:[%s2840_s10 + $0x30] ss:$8 sps:$4 sm:$0xff]   ;;  %v2300_v29 = vld [vmem:[#allocation8 + $0xa0] ss:$8 sps:$4 sm:$0xff]  }
  0x85   : > { %1526 = vmatpush1.bf16.msra.mxu0 %v2276_v37  ;;  %v2232_v9 = vld [vmem:[#allocation6 + $0xc8] ss:$16 sps:$4 sm:$0xff]   ;;  %v2237_v10 = vld [vmem:[#allocation6 + $0xec] ss:$16 sps:$4 sm:$0xff]   ;;  %s1908_s6 = sshll.u32 %s2836_s24, 7  ;;  %s2054_s11 = sshll.u32 %s2592_s21, 11 }
  0x86   : > { %812 = vmatpush1.bf16.msra.mxu1 %v2180_v14  ;;  %1527 = vmatprep.subr.bf16.mxu0 %v2277_v38  ;;  %v2235_v11 = vld [vmem:[#allocation6 + $0xe8] ss:$16 sps:$4 sm:$0xff]   ;;  %v2243_v12 = vld [vmem:[#allocation6 + $0x10c] ss:$16 sps:$4 sm:$0xff]   ;;  %s2985_s9 = scalar_lea.vmem [#allocation9], %s1908_s6  ;;  %s3005_s14 = scalar_lea.hbm %s3064_s5, %s2054_s11 }
  0x87   : > { %813 = vmatprep.subr.bf16.mxu1 %v2181_v15  ;;  %v2241_v14 = vld [vmem:[#allocation6 + $0x108] ss:$16 sps:$4 sm:$0xff]   ;;  %v2246_v15 = vld [vmem:[#allocation6 + $0x12c] ss:$16 sps:$4 sm:$0xff]   ;;  %s1777_s13 = sshll.u32 %s2985_s9, 4  ;;  %s1763_s21 = scalar_lea.sflag [#allocation5], %s2836_s24  ;;  %s3007_s13 = int_to_ptr.vmem [resolvable:$true] %s1777_s13 }
  0x88   : > { %v2298_v28 = vld [vmem:[#allocation8 + $0xa4] ss:$8 sps:$4 sm:$0xff]   ;;  %v2303_v31 = vld [vmem:[#allocation8 + $0xb0] ss:$8 sps:$4 sm:$0xff]   ;;  %v2306_v33 = vld [vmem:[#allocation8 + $0xc0] ss:$8 sps:$4 sm:$0xff]  }
  0x89   : > { %1528 = vmatpush1.bf16.msra.mxu0 %v2279_v41  ;;  %v2307_v34 = vld [vmem:[#allocation8 + $0xd4] ss:$8 sps:$4 sm:$0xff]   ;;  %v2312_v37 = vld [vmem:[#allocation8 + $0xe0] ss:$8 sps:$4 sm:$0xff]   ;;  %v419_v41 = vlaneseq  ;;  %s2514_s27 = scalar_lea.vmem %s3007_s13, 2048  ;;  %p3081_p12 = scmp.ne.s32.totalorder %s3076_s8, 0 }
  0x8a   : > { %814 = vmatpush1.bf16.msra.mxu1 %v2183_v16  ;;  %1529 = vmatprep.subr.bf16.mxu0 %v2280_v43  ;;  %v2244_v16 = vld [vmem:[#allocation6 + $0x128] ss:$16 sps:$4 sm:$0xff]   ;;  %v2313_v38 = vld [vmem:[#allocation8 + $0xf4] ss:$8 sps:$4 sm:$0xff]   ;;  %p2515_p8 = scmp.ne.s32.totalorder %s3007_s13, %s2514_s27  ;;  %s2609_s15 = smov [#allocation9]  }
  0x8b   : > { %815 = vmatprep.subr.bf16.mxu1 %v2184_v17  ;;  %v2252_v17 = vld [vmem:[#allocation6 + $0x14c] ss:$16 sps:$4 sm:$0xff]   ;;  %s2518_s10 = sshll.u32 %s2609_s15, 4  ;;  %s2519_s10 = int_to_ptr.vmem [resolvable:$false] %s2518_s10 }
  0x8c   : > { %p2516_p1 = pnand %p2515_p8, %p3081_p12  ;;  %s2520_s26 = scalar_lea.vmem %s2519_s10, 4096 }
  0x8d   : > { %1530 = vmatpush1.bf16.msra.mxu0 %v2282_v47  ;;  %p2521_p3 = scmp.lt.s32.totalorder %s3007_s13, %s2519_s10  ;;  %p2522_p5 = scmp.lt.s32.totalorder %s2520_s26, %s2514_s27 }
  0x8e   : > { %816 = vmatpush1.bf16.msra.mxu1 %v2186_v18  ;;  %1531 = vmatprep.subr.bf16.mxu0 %v2283_v48  ;;  %v2250_v18 = vld [vmem:[#allocation6 + $0x148] ss:$16 sps:$4 sm:$0xff]   ;;  %p2517_p10 = pneg %p2516_p1 }
  0x8f   : > { %817 = vmatprep.subr.bf16.mxu1 %v2187_v19  ;;  %v2255_v19 = vld [vmem:[#allocation6 + $0x16c] ss:$16 sps:$4 sm:$0xff]   ;;  %p2523_p9 = por %p2522_p5, %p2521_p3 }
  0x91   : > { %1532 = vmatpush1.bf16.msra.mxu0 %v2285_v51  ;;  %p2524_p11 = pnand %p2523_p9, %p2517_p10 }
  0x92   : > { %818 = vmatpush1.bf16.msra.mxu1 %v2189_v20  ;;  %1533 = vmatprep.subr.bf16.mxu0 %v2286_v52  ;;  %v2253_v20 = vld [vmem:[#allocation6 + $0x168] ss:$16 sps:$4 sm:$0xff]  }
  0x93   : > { %819 = vmatprep.subr.bf16.mxu1 %v2190_v21  ;;  %v2258_v21 = vld [vmem:[#allocation6 + $0x18c] ss:$16 sps:$4 sm:$0xff]  }
  0x95   : > { %1534 = vmatpush1.bf16.msra.mxu0 %v2288_v57 }
  0x96   : > { %820 = vmatpush1.bf16.msra.mxu1 %v2192_v22  ;;  %1535 = vmatprep.subr.bf16.mxu0 %v2289_v58  ;;  %v2261_v22 = vld [vmem:[#allocation6 + $0x1ac] ss:$16 sps:$4 sm:$0xff]  }
  0x97   : > { %821 = vmatprep.subr.bf16.mxu1 %v2193_v23  ;;  %v2259_v23 = vld [vmem:[#allocation6 + $0x1a8] ss:$16 sps:$4 sm:$0xff]  }
  0x99   : > { %1536 = vmatpush1.bf16.msra.mxu0 %v2291_v61 }
  0x9a   : > { %822 = vmatpush1.bf16.msra.mxu1 %v2195_v24  ;;  %1537 = vmatprep.subr.bf16.mxu0 %v2292_v62  ;;  %v2264_v24 = vld [vmem:[#allocation6 + $0x1cc] ss:$16 sps:$4 sm:$0xff]  }
  0x9b   : > { %823 = vmatprep.subr.bf16.mxu1 %v2196_v25  ;;  %v2262_v25 = vld [vmem:[#allocation6 + $0x1c8] ss:$16 sps:$4 sm:$0xff]  }
  0x9d   : > { %1538 = vmatpush1.bf16.msra.mxu0 %v2294_v3 }
  0x9e   : > { %824 = vmatpush1.bf16.msra.mxu1 %v2198_v26  ;;  %1539 = vmatprep.subr.bf16.mxu0 %v2295_v4  ;;  %v2267_v26 = vld [vmem:[#allocation6 + $0x1ec] ss:$16 sps:$4 sm:$0xff]  }
  0x9f   : > { %825 = vmatprep.subr.bf16.mxu1 %v2199_v27  ;;  %v2265_v27 = vld [vmem:[#allocation6 + $0x1e8] ss:$16 sps:$4 sm:$0xff]  }
  0xa1   : > { %1540 = vmatpush1.bf16.msra.mxu0 %v2297_v7 }
  0xa2   : > { %826 = vmatpush1.bf16.msra.mxu1 %v2201_v30  ;;  %1541 = vmatprep.subr.bf16.mxu0 %v2298_v28  ;;  %v2301_v30 = vld [vmem:[#allocation8 + $0xb4] ss:$8 sps:$4 sm:$0xff]  }
  0xa3   : > { %827 = vmatprep.subr.bf16.mxu1 %v2202_v32  ;;  %v2304_v32 = vld [vmem:[#allocation8 + $0xc4] ss:$8 sps:$4 sm:$0xff]  }
  0xa5   : > { %1542 = vmatpush1.bf16.msra.mxu0 %v2300_v29 }
  0xa6   : > { %828 = vmatpush1.bf16.msra.mxu1 %v2204_v35  ;;  %1543 = vmatprep.subr.bf16.mxu0 %v2301_v30  ;;  %v2309_v35 = vld [vmem:[#allocation8 + $0xd0] ss:$8 sps:$4 sm:$0xff]  }
  0xa7   : > { %829 = vmatprep.subr.bf16.mxu1 %v2205_v36  ;;  %v2310_v36 = vld [vmem:[#allocation8 + $0xe4] ss:$8 sps:$4 sm:$0xff]  }
  0xa9   : > { %1544 = vmatpush1.bf16.msra.mxu0 %v2303_v31 }
  0xaa   : > { %830 = vmatpush1.bf16.msra.mxu1 %v2207_v39  ;;  %1545 = vmatprep.subr.bf16.mxu0 %v2304_v32  ;;  %v2315_v39 = vld [vmem:[#allocation8 + $0xf0] ss:$8 sps:$4 sm:$0xff]  }
  0xab   : > { %872 = vmatprep.subr.bf16.mxu1 %v2213_v40  ;;  %v2318_v40 = vld [vmem:[#allocation8 + $0x104] ss:$8 sps:$4 sm:$0xff]  }
  0xad   : > { %832 = vmatmul.mubr.bf16.vlgmr.msra.gmra.mrb[0].mxu1 %v2855_v42  ;;  %1546 = vmatpush1.bf16.msra.mxu0 %v2306_v33 }
  0xae   : > { %873 = vmatpush1.bf16.msra.mxu1 %v2211_v44  ;;  %841 = vmatprep.mubr.bf16.mxu1 %v2858_v45  ;;  %v2892_v44 = vld [vmem:[%s3061_s2] sm:$0xf] }
  0xaf   : > { %874 = vmatprep.subr.bf16.mxu1 %v2216_v46  ;;  %1547 = vmatprep.subr.bf16.mxu0 %v2307_v34 }
  0xb1   : > { %1548 = vmatpush1.bf16.msra.mxu0 %v2309_v35 }
  0xb2   : > { %875 = vmatpush1.bf16.msra.mxu1 %v2214_v49  ;;  %1549 = vmatprep.subr.bf16.mxu0 %v2310_v36 }
  0xb3   : > { %876 = vmatprep.subr.bf16.mxu1 %v2219_v50 }
  0xb5   : > { %842 = vmatmul.mubr.bf16.gmra.mrb[4].mxu1 %v2863_v53  ;;  %1550 = vmatpush1.bf16.msra.mxu0 %v2312_v37 }
  0xb6   : > { %877 = vmatpush1.bf16.msra.mxu1 %v2217_v54  ;;  %851 = vmatprep.mubr.bf16.mxu1 %v2866_v55 }
  0xb7   : > { %878 = vmatprep.subr.bf16.mxu1 %v2222_v56  ;;  %1551 = vmatprep.subr.bf16.mxu0 %v2313_v38 }
  0xb9   : > { %1552 = vmatpush1.bf16.msra.mxu0 %v2315_v39 }
  0xba   : > { %879 = vmatpush1.bf16.msra.mxu1 %v2220_v59  ;;  %1594 = vmatprep.subr.bf16.mxu0 %v2318_v40  ;;  %v2316_v40 = vld [vmem:[#allocation8 + $0x100] ss:$8 sps:$4 sm:$0xff]  }
  0xbb   : > { %880 = vmatprep.subr.bf16.mxu1 %v2225_v60 }
  0xbd   : > { %852 = vmatmul.mubr.bf16.gmra.mrb[8].mxu1 %v2871_v63 }
  0xbe   : > { %881 = vmatpush1.bf16.msra.mxu1 %v2223_v0  ;;  %861 = vmatprep.mubr.bf16.mxu1 %v2874_v1 }
  0xbf   : > { %882 = vmatprep.subr.bf16.mxu1 %v2228_v2 }
  0xc2   : > { %883 = vmatpush1.bf16.msra.mxu1 %v2226_v5 }
  0xc3   : > { %884 = vmatprep.subr.bf16.mxu1 %v2234_v6 }
  0xc5   : > { %862 = vmatmul.mubr.bf16.gmra.mrb[12].mxu1 %v2249_v8 }
  0xc6   : > { %885 = vmatpush1.bf16.msra.mxu1 %v2232_v9  ;;  %904 = vmatprep.mubr.bf16.mxu1 %v2851_v13  ;;  %v2256_v13 = vld [vmem:[#allocation6 + $0x188] ss:$16 sps:$4 sm:$0xff]  }
  0xc7   : > { %886 = vmatprep.subr.bf16.mxu1 %v2237_v10 }
  0xca   : > { %887 = vmatpush1.bf16.msra.mxu1 %v2235_v11 }
  0xcb   : > { %888 = vmatprep.subr.bf16.mxu1 %v2243_v12 }
  0xce   : > { %889 = vmatpush1.bf16.msra.mxu1 %v2241_v14 }
  0xcf   : > { %890 = vmatprep.subr.bf16.mxu1 %v2246_v15 }
  0xd2   : > { %891 = vmatpush1.bf16.msra.mxu1 %v2244_v16 }
  0xd3   : > { %892 = vmatprep.subr.bf16.mxu1 %v2252_v17 }
  0xd6   : > { %893 = vmatpush1.bf16.msra.mxu1 %v2250_v18 }
  0xd7   : > { %894 = vmatprep.subr.bf16.mxu1 %v2255_v19 }
  0xda   : > { %895 = vmatpush1.bf16.msra.mxu1 %v2253_v20 }
  0xdb   : > { %896 = vmatprep.subr.bf16.mxu1 %v2258_v21 }
  0xde   : > { %897 = vmatpush1.bf16.msra.mxu1 %v2256_v13 }
  0xdf   : > { %898 = vmatprep.subr.bf16.mxu1 %v2261_v22 }
  0xe2   : > { %899 = vmatpush1.bf16.msra.mxu1 %v2259_v23 }
  0xe3   : > { %900 = vmatprep.subr.bf16.mxu1 %v2264_v24 }
  0xe6   : > { %901 = vmatpush1.bf16.msra.mxu1 %v2262_v25 }
  0xe7   : > { %902 = vmatprep.subr.bf16.mxu1 %v2267_v26 }
  0xea   : > { %903 = vmatpush1.bf16.msra.mxu1 %v2265_v27 }
  0xed   : > { %905 = vmatmul.mubr.bf16.vlgmr.msra.gmra.mrb[16].mxu1 %v2855_v42  ;;  %v2886_v42 = vshrl.u32 %v419_v41, 7 }
  0xee   : > { %914 = vmatprep.mubr.bf16.mxu1 %v2858_v45 }
  0xef   : > { %v421_v43 = vsub.s32 0, %v2886_v42  ;;  %v425_v45 = vsub.s32 1, %v2886_v42 }
  0xf1   : > { %v2898_v46 = vrot.slane %v2892_v44, %v421_v43  ;;  %v2903_v47 = vrot.slane %v2892_v44, %v425_v45 }
  0xf5   : > { %915 = vmatmul.mubr.bf16.gmra.mrb[20].mxu1 %v2863_v53 }
  0xf6   : > { %924 = vmatprep.mubr.bf16.mxu1 %v2866_v55 }
  0xfd   : > { %925 = vmatmul.mubr.bf16.gmra.mrb[24].mxu1 %v2871_v63 }
  0xfe   : > { %934 = vmatprep.mubr.bf16.mxu1 %v2874_v1 }
 0x105   : > { %935 = vmatmul.mubr.bf16.gmra.mrb[28].mxu1 %v2249_v8 }
 0x180   : > { %v833_v48 = vpop.f32.mrb[0].mxu1 }
 0x181   : > { %v834_v49 = vadd.f32 %v833_v48, %v2898_v46  ;;  %v835_v50 = vpop.f32.mrb[1].mxu1 }
 0x182   : > { %v836_v51 = vadd.f32 %v835_v50, %v2903_v47  ;;  %v837_v52 = vpop.f32.mrb[2].mxu1 }
 0x183   : > { %v977_v53 = vmul.f32 0.70710677, %v834_v49  ;;  %v838_v54 = vadd.f32 %v837_v52, %v2898_v46  ;;  %v839_v55 = vpop.f32.mrb[3].mxu1  ;;  %v945_v18 = vmul.f32 0.5, %v834_v49 }
 0x184   : > { %v978_v56 = vmul.f32 0.70710677, %v836_v51  ;;  %v840_v57 = vadd.f32 %v839_v55, %v2903_v47  ;;  %v946_v22 = vmul.f32 0.5, %v836_v51  ;;  %v2321_v51 = vld [vmem:[#allocation8 + $0x114] ss:$8 sps:$4 sm:$0xff]  }
 0x185   : > { %2364 = verf.f32 %v977_v53  ;;  %v981_v58 = vmul.f32 0.70710677, %v838_v54  ;;  %v949_v19 = vmul.f32 0.5, %v838_v54 }
 0x186   : > { %2366 = verf.f32 %v978_v56  ;;  %v982_v59 = vmul.f32 0.70710677, %v840_v57  ;;  %v950_v23 = vmul.f32 0.5, %v840_v57 }
 0x187   : > { %2368 = verf.f32 %v981_v58 }
 0x188   : > { %2370 = verf.f32 %v982_v59  ;;  %v843_v60 = vpop.f32.mrb[4].mxu1 }
 0x189   : > { %v844_v61 = vadd.f32 %v843_v60, %v2898_v46  ;;  %v845_v62 = vpop.f32.mrb[5].mxu1 }
 0x18a   : > { %v846_v63 = vadd.f32 %v845_v62, %v2903_v47  ;;  %v847_v0 = vpop.f32.mrb[6].mxu1 }
 0x18b   : > { %v985_v1 = vmul.f32 0.70710677, %v844_v61  ;;  %v848_v2 = vadd.f32 %v847_v0, %v2898_v46  ;;  %v849_v3 = vpop.f32.mrb[7].mxu1  ;;  %v953_v34 = vmul.f32 0.5, %v844_v61 }
 0x18c   : > { %v986_v4 = vmul.f32 0.70710677, %v846_v63  ;;  %v850_v5 = vadd.f32 %v849_v3, %v2903_v47  ;;  %v954_v38 = vmul.f32 0.5, %v846_v63 }
 0x18d   : > { %2372 = verf.f32 %v985_v1  ;;  %v989_v6 = vmul.f32 0.70710677, %v848_v2  ;;  %v957_v50 = vmul.f32 0.5, %v848_v2  ;;  %v2319_v1 = vld [vmem:[#allocation8 + $0x110] ss:$8 sps:$4 sm:$0xff]  }
 0x18e   : > { %2374 = verf.f32 %v986_v4  ;;  %v990_v7 = vmul.f32 0.70710677, %v850_v5  ;;  %v958_v55 = vmul.f32 0.5, %v850_v5  ;;  %v2324_v5 = vld [vmem:[#allocation8 + $0x124] ss:$8 sps:$4 sm:$0xff]  }
 0x18f   : > { %v2365_v8 = vpop.eup %2364  ;;  %2376 = verf.f32 %v989_v6 }
 0x190   : > { %v2367_v9 = vpop.eup %2366  ;;  %v1041_v10 = vadd.f32 1.0, %v2365_v8  ;;  %2378 = verf.f32 %v990_v7  ;;  %v853_v11 = vpop.f32.mrb[8].mxu1 }
 0x191   : > { %v2369_v12 = vpop.eup %2368  ;;  %v1042_v14 = vadd.f32 1.0, %v2367_v9  ;;  %v2914_v15 = vadd.f32 %v853_v11, %v2898_v46  ;;  %v855_v16 = vpop.f32.mrb[9].mxu1 }
 0x192   : > { %v2371_v17 = vpop.eup %2370  ;;  %v1045_v20 = vadd.f32 1.0, %v2369_v12  ;;  %v2917_v21 = vadd.f32 %v855_v16, %v2903_v47  ;;  %v857_v13 = vpop.f32.mrb[10].mxu1  ;;  %v1073_v27 = vmul.f32 %v1041_v10, %v945_v18  ;;  %v2322_v16 = vld [vmem:[#allocation8 + $0x120] ss:$8 sps:$4 sm:$0xff]  }
 0x193   : > { %v1046_v24 = vadd.f32 1.0, %v2371_v17  ;;  %v993_v25 = vmul.f32 0.70710677, %v2914_v15  ;;  %v859_v26 = vpop.f32.mrb[11].mxu1  ;;  %v858_v30 = vadd.f32 %v857_v13, %v2898_v46  ;;  %v1074_v31 = vmul.f32 %v1042_v14, %v946_v22 }
 0x194   : > { %v1077_v28 = vmul.f32 %v1045_v20, %v949_v19  ;;  %v994_v29 = vmul.f32 0.70710677, %v2917_v21  ;;  %v860_v33 = vadd.f32 %v859_v26, %v2903_v47  ;;  %v961_v14 = vmul.f32 0.5, %v2914_v15 }
 0x195   : > { %v1078_v32 = vmul.f32 %v1046_v24, %v950_v23  ;;  %2380 = verf.f32 %v993_v25  ;;  %v997_v36 = vmul.f32 0.70710677, %v858_v30  ;;  %v962_v13 = vmul.f32 0.5, %v2917_v21 }
 0x196   : > { %v1121_v35 = vpack.c.bf16 %v1077_v28, %v1073_v27  ;;  %2382 = verf.f32 %v994_v29  ;;  %v998_v41 = vmul.f32 0.70710677, %v860_v33  ;;  %v965_v23 = vmul.f32 0.5, %v858_v30  ;;  %v2325_v27 = vld [vmem:[#allocation8 + $0x130] ss:$8 sps:$4 sm:$0xff]  }
 0x197   : > { %v2373_v37 = vpop.eup %2372  ;;  %v1122_v39 = vpack.c.bf16 %v1078_v32, %v1074_v31  ;;  %2384 = verf.f32 %v997_v36  ;;  %v966_v24 = vmul.f32 0.5, %v860_v33  ;;  %v2330_v31 = vld [vmem:[#allocation8 + $0x144] ss:$8 sps:$4 sm:$0xff]   ;;  %v2328_v30 = vld [vmem:[#allocation8 + $0x140] ss:$8 sps:$4 sm:$0xff]  }
 0x198   : > { %v2375_v48 = vpop.eup %2374  ;;  %v1049_v49 = vadd.f32 1.0, %v2373_v37  ;;  %v863_v52 = vpop.f32.mrb[12].mxu1  ;;  %2386 = verf.f32 %v998_v41 }
 0x199   : > { %v2377_v53 = vpop.eup %2376  ;;  %v1050_v54 = vadd.f32 1.0, %v2375_v48  ;;  %1553 = vmatprep.mubr.bf16.mxu0 %v1122_v39  ;;  %v864_v56 = vadd.f32 %v863_v52, %v2898_v46  ;;  %v865_v57 = vpop.f32.mrb[13].mxu1  ;;  %v2333_v39 = vld [vmem:[#allocation8 + $0x154] ss:$8 sps:$4 sm:$0xff]  }
 0x19a   : > { %v2379_v58 = vpop.eup %2378  ;;  %v1081_v59 = vmul.f32 %v1049_v49, %v953_v34  ;;  %v1053_v60 = vadd.f32 1.0, %v2377_v53  ;;  %1554 = vmatmul.mubr.bf16.vlgmr.msra.gmra.mrb[0].mxu0 %v1121_v35  ;;  %v866_v61 = vadd.f32 %v865_v57, %v2903_v47  ;;  %v867_v62 = vpop.f32.mrb[14].mxu1  ;;  %v2336_v57 = vld [vmem:[#allocation8 + $0x164] ss:$8 sps:$4 sm:$0xff]  }
 0x19b   : > { %v1082_v63 = vmul.f32 %v1050_v54, %v954_v38  ;;  %v1054_v0 = vadd.f32 1.0, %v2379_v58  ;;  %1595 = vmatpush1.bf16.msra.mxu0 %v2316_v40  ;;  %v1001_v2 = vmul.f32 0.70710677, %v864_v56  ;;  %v869_v3 = vpop.f32.mrb[15].mxu1  ;;  %v868_v7 = vadd.f32 %v867_v62, %v2898_v46  ;;  %v2327_v46 = vld [vmem:[#allocation8 + $0x134] ss:$8 sps:$4 sm:$0xff]  }
 0x19c   : > { %v1085_v4 = vmul.f32 %v1053_v60, %v957_v50  ;;  %1596 = vmatprep.subr.bf16.mxu0 %v2321_v51  ;;  %v1002_v6 = vmul.f32 0.70710677, %v866_v61  ;;  %v870_v9 = vadd.f32 %v869_v3, %v2903_v47  ;;  %v969_v35 = vmul.f32 0.5, %v864_v56  ;;  %v2331_v54 = vld [vmem:[#allocation8 + $0x150] ss:$8 sps:$4 sm:$0xff]  }
 0x19d   : > { %v1086_v8 = vmul.f32 %v1054_v0, %v958_v55  ;;  %2388 = verf.f32 %v1001_v2  ;;  %v1005_v10 = vmul.f32 0.70710677, %v868_v7  ;;  %v970_v33 = vmul.f32 0.5, %v866_v61  ;;  %v2334_v60 = vld [vmem:[#allocation8 + $0x160] ss:$8 sps:$4 sm:$0xff]  }
 0x19e   : > { %2390 = verf.f32 %v1002_v6  ;;  %v1125_v11 = vpack.c.bf16 %v1085_v4, %v1081_v59  ;;  %v1006_v17 = vmul.f32 0.70710677, %v870_v9  ;;  %v973_v48 = vmul.f32 0.5, %v868_v7  ;;  %v2339_v62 = vld [vmem:[#allocation8 + $0x174] ss:$8 sps:$4 sm:$0xff]  }
 0x19f   : > { %v2381_v12 = vpop.eup %2380  ;;  %1597 = vmatpush1.bf16.msra.mxu0 %v2319_v1  ;;  %v1126_v18 = vpack.c.bf16 %v1086_v8, %v1082_v63  ;;  %2392 = verf.f32 %v1005_v10  ;;  %v974_v50 = vmul.f32 0.5, %v870_v9  ;;  %v2337_v0 = vld [vmem:[#allocation8 + $0x170] ss:$8 sps:$4 sm:$0xff]   ;;  %v2342_v1 = vld [vmem:[#allocation8 + $0x184] ss:$8 sps:$4 sm:$0xff]   ;;  %v429_v4 = vsub.s32 2, %v2886_v42 }
 0x1a0   : > { %v2383_v19 = vpop.eup %2382  ;;  %v1057_v20 = vadd.f32 1.0, %v2381_v12  ;;  %1598 = vmatprep.subr.bf16.mxu0 %v2324_v5  ;;  %2394 = verf.f32 %v1006_v17  ;;  %v2340_v2 = vld [vmem:[#allocation8 + $0x180] ss:$8 sps:$4 sm:$0xff]   ;;  %v2345_v3 = vld [vmem:[#allocation8 + $0x194] ss:$8 sps:$4 sm:$0xff]   ;;  %v433_v5 = vsub.s32 3, %v2886_v42 }
 0x1a1   : > { %v1058_v22 = vadd.f32 1.0, %v2383_v19  ;;  %1563 = vmatprep.mubr.bf16.mxu0 %v1126_v18  ;;  %v2385_v47 = vpop.eup %2384  ;;  %v2343_v6 = vld [vmem:[#allocation8 + $0x190] ss:$8 sps:$4 sm:$0xff]   ;;  %v2348_v7 = vld [vmem:[#allocation8 + $0x1a4] ss:$8 sps:$4 sm:$0xff]   ;;  %v2932_v8 = vrot.slane %v2892_v44, %v429_v4 }
 0x1a2   : > { %1564 = vmatmul.mubr.bf16.gmra.mrb[4].mxu0 %v1125_v11  ;;  %v2387_v25 = vpop.eup %2386  ;;  %v1089_v15 = vmul.f32 %v1057_v20, %v961_v14  ;;  %v1061_v26 = vadd.f32 1.0, %v2385_v47  ;;  %v2935_v9 = vrot.slane %v2892_v44, %v433_v5  ;;  %v2346_v10 = vld [vmem:[#allocation8 + $0x1a0] ss:$8 sps:$4 sm:$0xff]   ;;  %v2351_v12 = vld [vmem:[#allocation8 + $0x1b4] ss:$8 sps:$4 sm:$0xff]  }
 0x1a3   : > { %1599 = vmatpush1.bf16.msra.mxu0 %v2322_v16  ;;  %v1090_v28 = vmul.f32 %v1058_v22, %v962_v13  ;;  %v1062_v29 = vadd.f32 1.0, %v2387_v25  ;;  %v2352_v25 = vld [vmem:[#allocation8 + $0x1c0] ss:$8 sps:$4 sm:$0xff]  }
 0x1a4   : > { %1600 = vmatprep.subr.bf16.mxu0 %v2327_v46  ;;  %v1093_v21 = vmul.f32 %v1061_v26, %v965_v23  ;;  %v2349_v46 = vld [vmem:[#allocation8 + $0x1b0] ss:$8 sps:$4 sm:$0xff]   ;;  %v2354_v23 = vld [vmem:[#allocation8 + $0x1c4] ss:$8 sps:$4 sm:$0xff]   ;;  %v2357_v26 = vld [vmem:[#allocation8 + $0x1d4] ss:$8 sps:$4 sm:$0xff]  }
 0x1a5   : > { %v1094_v32 = vmul.f32 %v1062_v29, %v966_v24 }
 0x1a6   : > { %v1129_v36 = vpack.c.bf16 %v1093_v21, %v1089_v15 }
 0x1a7   : > { %v2389_v34 = vpop.eup %2388  ;;  %1601 = vmatpush1.bf16.msra.mxu0 %v2325_v27  ;;  %v1130_v40 = vpack.c.bf16 %v1094_v32, %v1090_v28 }
 0x1a8   : > { %v2391_v37 = vpop.eup %2390  ;;  %v1065_v38 = vadd.f32 1.0, %v2389_v34  ;;  %1602 = vmatprep.subr.bf16.mxu0 %v2330_v31 }
 0x1a9   : > { %v1066_v41 = vadd.f32 1.0, %v2391_v37  ;;  %v2393_v49 = vpop.eup %2392  ;;  %1573 = vmatprep.mubr.bf16.mxu0 %v1130_v40  ;;  %v2360_v37 = vld [vmem:[#allocation8 + $0x1e4] ss:$8 sps:$4 sm:$0xff]   ;;  %v2358_v40 = vld [vmem:[#allocation8 + $0x1e0] ss:$8 sps:$4 sm:$0xff]  }
 0x1aa   : > { %v2395_v51 = vpop.eup %2394  ;;  %v1097_v52 = vmul.f32 %v1065_v38, %v969_v35  ;;  %v1069_v53 = vadd.f32 1.0, %v2393_v49  ;;  %1574 = vmatmul.mubr.bf16.gmra.mrb[8].mxu0 %v1129_v36  ;;  %v2355_v35 = vld [vmem:[#allocation8 + $0x1d0] ss:$8 sps:$4 sm:$0xff]  }
 0x1ab   : > { %1603 = vmatpush1.bf16.msra.mxu0 %v2328_v30  ;;  %v1098_v55 = vmul.f32 %v1066_v41, %v970_v33  ;;  %v1070_v56 = vadd.f32 1.0, %v2395_v51 }
 0x1ac   : > { %1604 = vmatprep.subr.bf16.mxu0 %v2333_v39  ;;  %v1101_v58 = vmul.f32 %v1069_v53, %v973_v48 }
 0x1ad   : > { %v1102_v59 = vmul.f32 %v1070_v56, %v974_v50  ;;  %v2363_v50 = vld [vmem:[#allocation8 + $0x1f4] ss:$8 sps:$4 sm:$0xff]  }
 0x1ae   : > { %v1133_v61 = vpack.c.bf16 %v1101_v58, %v1097_v52 }
 0x1af   : > { %1605 = vmatpush1.bf16.msra.mxu0 %v2331_v54  ;;  %v1134_v63 = vpack.c.bf16 %v1102_v59, %v1098_v55 }
 0x1b0   : > { %1606 = vmatprep.subr.bf16.mxu0 %v2336_v57 }
 0x1b1   : > { %1583 = vmatprep.mubr.bf16.mxu0 %v1134_v63 }
 0x1b2   : > { %1584 = vmatmul.mubr.bf16.gmra.mrb[12].mxu0 %v1133_v61  ;;  %v2361_v61 = vld [vmem:[#allocation8 + $0x1f0] ss:$8 sps:$4 sm:$0xff]  }
 0x1b3   : > { %1607 = vmatpush1.bf16.msra.mxu0 %v2334_v60 }
 0x1b4   : > { %1608 = vmatprep.subr.bf16.mxu0 %v2339_v62 }
 0x1b7   : > { %1609 = vmatpush1.bf16.msra.mxu0 %v2337_v0 }
 0x1b8   : > { %1610 = vmatprep.subr.bf16.mxu0 %v2342_v1 }
 0x1bb   : > { %1611 = vmatpush1.bf16.msra.mxu0 %v2340_v2 }
 0x1bc   : > { %1612 = vmatprep.subr.bf16.mxu0 %v2345_v3 }
 0x1bf   : > { %1613 = vmatpush1.bf16.msra.mxu0 %v2343_v6 }
 0x1c0   : > { %v906_v11 = vpop.f32.mrb[16].mxu1  ;;  %1614 = vmatprep.subr.bf16.mxu0 %v2348_v7 }
 0x1c1   : > { %v907_v14 = vadd.f32 %v906_v11, %v2932_v8  ;;  %v908_v16 = vpop.f32.mrb[17].mxu1 }
 0x1c2   : > { %v909_v17 = vadd.f32 %v908_v16, %v2935_v9  ;;  %v910_v18 = vpop.f32.mrb[18].mxu1 }
 0x1c3   : > { %v979_v19 = vmul.f32 0.70710677, %v907_v14  ;;  %v911_v20 = vadd.f32 %v910_v18, %v2932_v8  ;;  %v912_v13 = vpop.f32.mrb[19].mxu1  ;;  %1615 = vmatpush1.bf16.msra.mxu0 %v2346_v10  ;;  %v947_v56 = vmul.f32 0.5, %v907_v14 }
 0x1c4   : > { %v980_v22 = vmul.f32 0.70710677, %v909_v17  ;;  %v913_v44 = vadd.f32 %v912_v13, %v2935_v9  ;;  %1616 = vmatprep.subr.bf16.mxu0 %v2351_v12  ;;  %v948_v62 = vmul.f32 0.5, %v909_v17 }
 0x1c5   : > { %2396 = verf.f32 %v979_v19  ;;  %v983_v47 = vmul.f32 0.70710677, %v911_v20  ;;  %v951_v57 = vmul.f32 0.5, %v911_v20 }
 0x1c6   : > { %2398 = verf.f32 %v980_v22  ;;  %v984_v24 = vmul.f32 0.70710677, %v913_v44  ;;  %v952_v63 = vmul.f32 0.5, %v913_v44 }
 0x1c7   : > { %2400 = verf.f32 %v983_v47  ;;  %1617 = vmatpush1.bf16.msra.mxu0 %v2349_v46 }
 0x1c8   : > { %2402 = verf.f32 %v984_v24  ;;  %v916_v15 = vpop.f32.mrb[20].mxu1  ;;  %1618 = vmatprep.subr.bf16.mxu0 %v2354_v23 }
 0x1c9   : > { %v2942_v27 = vadd.f32 %v916_v15, %v2932_v8  ;;  %v918_v28 = vpop.f32.mrb[21].mxu1 }
 0x1ca   : > { %v2945_v29 = vadd.f32 %v918_v28, %v2935_v9  ;;  %v920_v31 = vpop.f32.mrb[22].mxu1 }
 0x1cb   : > { %v987_v21 = vmul.f32 0.70710677, %v2942_v27  ;;  %v2949_v32 = vadd.f32 %v920_v31, %v2932_v8  ;;  %v922_v34 = vpop.f32.mrb[23].mxu1  ;;  %1619 = vmatpush1.bf16.msra.mxu0 %v2352_v25  ;;  %v955_v24 = vmul.f32 0.5, %v2942_v27 }
 0x1cc   : > { %v988_v30 = vmul.f32 0.70710677, %v2945_v29  ;;  %v2953_v36 = vadd.f32 %v922_v34, %v2935_v9  ;;  %1620 = vmatprep.subr.bf16.mxu0 %v2357_v26  ;;  %v956_v31 = vmul.f32 0.5, %v2945_v29 }
 0x1cd   : > { %2404 = verf.f32 %v987_v21  ;;  %v991_v38 = vmul.f32 0.70710677, %v2949_v32  ;;  %v959_v25 = vmul.f32 0.5, %v2949_v32 }
 0x1ce   : > { %2406 = verf.f32 %v988_v30  ;;  %v992_v33 = vmul.f32 0.70710677, %v2953_v36  ;;  %v960_v21 = vmul.f32 0.5, %v2953_v36 }
 0x1cf   : > { %v2397_v39 = vpop.eup %2396  ;;  %2408 = verf.f32 %v991_v38  ;;  %1621 = vmatpush1.bf16.msra.mxu0 %v2355_v35 }
 0x1d0   : > { %v2399_v41 = vpop.eup %2398  ;;  %v1043_v48 = vadd.f32 1.0, %v2397_v39  ;;  %2410 = verf.f32 %v992_v33  ;;  %v926_v49 = vpop.f32.mrb[24].mxu1  ;;  %1622 = vmatprep.subr.bf16.mxu0 %v2360_v37 }
 0x1d1   : > { %v2401_v51 = vpop.eup %2400  ;;  %v1044_v52 = vadd.f32 1.0, %v2399_v41  ;;  %v2958_v53 = vadd.f32 %v926_v49, %v2932_v8  ;;  %v928_v54 = vpop.f32.mrb[25].mxu1 }
 0x1d2   : > { %v2403_v55 = vpop.eup %2402  ;;  %v1047_v58 = vadd.f32 1.0, %v2401_v51  ;;  %v2961_v59 = vadd.f32 %v928_v54, %v2935_v9  ;;  %v930_v60 = vpop.f32.mrb[26].mxu1  ;;  %v1075_v3 = vmul.f32 %v1043_v48, %v947_v56 }
 0x1d3   : > { %v1048_v0 = vadd.f32 1.0, %v2403_v55  ;;  %v995_v1 = vmul.f32 0.70710677, %v2958_v53  ;;  %v932_v2 = vpop.f32.mrb[27].mxu1  ;;  %1623 = vmatpush1.bf16.msra.mxu0 %v2358_v40  ;;  %v931_v6 = vadd.f32 %v930_v60, %v2932_v8  ;;  %v1076_v7 = vmul.f32 %v1044_v52, %v948_v62 }
 0x1d4   : > { %v1079_v4 = vmul.f32 %v1047_v58, %v951_v57  ;;  %v996_v5 = vmul.f32 0.70710677, %v2961_v59  ;;  %1624 = vmatprep.subr.bf16.mxu0 %v2363_v50  ;;  %v933_v11 = vadd.f32 %v932_v2, %v2935_v9  ;;  %v963_v55 = vmul.f32 0.5, %v2958_v53 }
 0x1d5   : > { %v1080_v10 = vmul.f32 %v1048_v0, %v952_v63  ;;  %2412 = verf.f32 %v995_v1  ;;  %v999_v14 = vmul.f32 0.70710677, %v931_v6  ;;  %v967_v56 = vmul.f32 0.5, %v931_v6 }
 0x1d6   : > { %v1123_v12 = vpack.c.bf16 %v1079_v4, %v1075_v3  ;;  %2414 = verf.f32 %v996_v5  ;;  %v1000_v17 = vmul.f32 0.70710677, %v933_v11  ;;  %v968_v58 = vmul.f32 0.5, %v933_v11 }
 0x1d7   : > { %v2405_v16 = vpop.eup %2404  ;;  %1625 = vmatpush1.bf16.msra.mxu0 %v2361_v61  ;;  %v1124_v18 = vpack.c.bf16 %v1080_v10, %v1076_v7  ;;  %2416 = verf.f32 %v999_v14 }
 0x1d8   : > { %v2407_v19 = vpop.eup %2406  ;;  %v1051_v20 = vadd.f32 1.0, %v2405_v16  ;;  %v936_v13 = vpop.f32.mrb[28].mxu1  ;;  %2418 = verf.f32 %v1000_v17 }
 0x1d9   : > { %v2409_v46 = vpop.eup %2408  ;;  %v1052_v22 = vadd.f32 1.0, %v2407_v19  ;;  %v937_v44 = vadd.f32 %v936_v13, %v2932_v8  ;;  %v938_v23 = vpop.f32.mrb[29].mxu1  ;;  %1626 = vmatprep.mubr.bf16.mxu0 %v1124_v18 }
 0x1da   : > { %v2411_v47 = vpop.eup %2410  ;;  %v1055_v15 = vadd.f32 1.0, %v2409_v46  ;;  %v939_v26 = vadd.f32 %v938_v23, %v2935_v9  ;;  %v940_v28 = vpop.f32.mrb[30].mxu1  ;;  %1627 = vmatmul.mubr.bf16.vlgmr.msra.gmra.mrb[0].mxu0 %v1123_v12  ;;  %v1083_v37 = vmul.f32 %v1051_v20, %v955_v24 }
 0x1db   : > { %v1056_v34 = vadd.f32 1.0, %v2411_v47  ;;  %v1003_v35 = vmul.f32 0.70710677, %v937_v44  ;;  %v942_v30 = vpop.f32.mrb[31].mxu1  ;;  %v941_v39 = vadd.f32 %v940_v28, %v2932_v8  ;;  %v1084_v27 = vmul.f32 %v1052_v22, %v956_v31  ;;  %v1718_v22 = vld [vmem:[%s3063_s4] sm:$0x3] }
 0x1dc   : > { %v1087_v38 = vmul.f32 %v1055_v15, %v959_v25  ;;  %v1004_v33 = vmul.f32 0.70710677, %v939_v26  ;;  %v943_v32 = vadd.f32 %v942_v30, %v2935_v9  ;;  %v964_v9 = vmul.f32 0.5, %v2961_v59 }
 0x1dd   : > { %v1088_v40 = vmul.f32 %v1056_v34, %v960_v21  ;;  %2420 = verf.f32 %v1003_v35  ;;  %v1007_v41 = vmul.f32 0.70710677, %v941_v39  ;;  %v971_v53 = vmul.f32 0.5, %v937_v44 }
 0x1de   : > { %2422 = verf.f32 %v1004_v33  ;;  %v1127_v48 = vpack.c.bf16 %v1087_v38, %v1083_v37  ;;  %v1008_v29 = vmul.f32 0.70710677, %v943_v32  ;;  %v975_v6 = vmul.f32 0.5, %v941_v39 }
 0x1df   : > { %v2413_v49 = vpop.eup %2412  ;;  %v1128_v50 = vpack.c.bf16 %v1088_v40, %v1084_v27  ;;  %2424 = verf.f32 %v1007_v41  ;;  %v972_v59 = vmul.f32 0.5, %v939_v26  ;;  %v976_v11 = vmul.f32 0.5, %v943_v32 }
 0x1e0   : > { %v2415_v36 = vpop.eup %2414  ;;  %v1059_v51 = vadd.f32 1.0, %v2413_v49  ;;  %2426 = verf.f32 %v1008_v29  ;;  %v1723_v44 = vrot.slane %v1718_v22, %v421_v43  ;;  %v1727_v23 = vrot.slane %v1718_v22, %v425_v45 }
 0x1e1   : > { %1636 = vmatprep.mubr.bf16.mxu0 %v1128_v50  ;;  %v2417_v52 = vpop.eup %2416  ;;  %v1060_v54 = vadd.f32 1.0, %v2415_v36 }
 0x1e2   : > { %1637 = vmatmul.mubr.bf16.gmra.mrb[4].mxu0 %v1127_v48  ;;  %v2419_v8 = vpop.eup %2418  ;;  %v1063_v57 = vadd.f32 1.0, %v2417_v52  ;;  %v1091_v61 = vmul.f32 %v1059_v51, %v963_v55 }
 0x1e3   : > { %v1064_v60 = vadd.f32 1.0, %v2419_v8  ;;  %v1092_v63 = vmul.f32 %v1060_v54, %v964_v9 }
 0x1e4   : > { %v1095_v62 = vmul.f32 %v1063_v57, %v967_v56 }
 0x1e5   : > { %v1096_v0 = vmul.f32 %v1064_v60, %v968_v58 }
 0x1e6   : > { %v1131_v2 = vpack.c.bf16 %v1095_v62, %v1091_v61 }
 0x1e7   : > { %v2421_v1 = vpop.eup %2420  ;;  %v1132_v4 = vpack.c.bf16 %v1096_v0, %v1092_v63 }
 0x1e8   : > { %v2423_v3 = vpop.eup %2422  ;;  %v1067_v5 = vadd.f32 1.0, %v2421_v1 }
 0x1e9   : > { %v2425_v7 = vpop.eup %2424  ;;  %v1068_v10 = vadd.f32 1.0, %v2423_v3  ;;  %1646 = vmatprep.mubr.bf16.mxu0 %v1132_v4 }
 0x1ea   : > { %v2427_v12 = vpop.eup %2426  ;;  %v1071_v14 = vadd.f32 1.0, %v2425_v7  ;;  %1647 = vmatmul.mubr.bf16.gmra.mrb[8].mxu0 %v1131_v2  ;;  %v1099_v17 = vmul.f32 %v1067_v5, %v971_v53 }
 0x1eb   : > { %v1072_v16 = vadd.f32 1.0, %v2427_v12  ;;  %v1100_v19 = vmul.f32 %v1068_v10, %v972_v59 }
 0x1ec   : > { %v1103_v18 = vmul.f32 %v1071_v14, %v975_v6 }
 0x1ed   : > { %v1104_v20 = vmul.f32 %v1072_v16, %v976_v11 }
 0x1ee   : > { %v1135_v13 = vpack.c.bf16 %v1103_v18, %v1099_v17 }
 0x1ef   : > { %v1136_v46 = vpack.c.bf16 %v1104_v20, %v1100_v19 }
 0x1f1   : > { %1656 = vmatprep.mubr.bf16.mxu0 %v1136_v46 }
 0x1f2   : > { %1657 = vmatmul.mubr.bf16.gmra.mrb[12].mxu0 %v1135_v13 }
 0x2ad   : > { %v1628_v47 = vpop.f32.mrb[0].mxu0 }
 0x2ae   : > { %v1730_v24 = vadd.f32 %v1723_v44, %v1628_v47  ;;  %v1630_v25 = vpop.f32.mrb[1].mxu0 }
 0x2af   : > { %v1731_v15 = vadd.f32 %v1727_v23, %v1630_v25  ;;  %v1632_v26 = vpop.f32.mrb[2].mxu0 }
 0x2b0   : > { %1746 = vst [vmem:[%s2985_s9] sm:$0xff] %v1730_v24  ;;  %v1732_v28 = vadd.f32 %v1723_v44, %v1632_v26  ;;  %v1634_v43 = vpop.f32.mrb[3].mxu0 }
 0x2b1   : > { %1747 = vst [vmem:[%s2985_s9 + $0x8] sm:$0xff] %v1731_v15  ;;  %v1733_v42 = vadd.f32 %v1727_v23, %v1634_v43 }
 0x2b2   : > { %1748 = vst [vmem:[%s2985_s9 + $0x10] sm:$0xff] %v1732_v28 }
 0x2b3   : > { %1749 = vst [vmem:[%s2985_s9 + $0x18] sm:$0xff] %v1733_v42 }
 0x2b5   : > { %v1638_v45 = vpop.f32.mrb[4].mxu0 }
 0x2b6   : > { %v1734_v31 = vadd.f32 %v1723_v44, %v1638_v45  ;;  %v1640_v21 = vpop.f32.mrb[5].mxu0 }
 0x2b7   : > { %v1735_v34 = vadd.f32 %v1727_v23, %v1640_v21  ;;  %v1642_v35 = vpop.f32.mrb[6].mxu0 }
 0x2b8   : > { %1750 = vst [vmem:[%s2985_s9 + $0x20] sm:$0xff] %v1734_v31  ;;  %v1736_v30 = vadd.f32 %v1723_v44, %v1642_v35  ;;  %v1644_v37 = vpop.f32.mrb[7].mxu0 }
 0x2b9   : > { %1751 = vst [vmem:[%s2985_s9 + $0x28] sm:$0xff] %v1735_v34  ;;  %v1737_v38 = vadd.f32 %v1727_v23, %v1644_v37 }
 0x2ba   : > { %1752 = vst [vmem:[%s2985_s9 + $0x30] sm:$0xff] %v1736_v30 }
 0x2bb   : > { %1753 = vst [vmem:[%s2985_s9 + $0x38] sm:$0xff] %v1737_v38 }
 0x2bd   : > { %v1648_v33 = vpop.f32.mrb[8].mxu0 }
 0x2be   : > { %v1738_v39 = vadd.f32 %v1723_v44, %v1648_v33  ;;  %v1650_v27 = vpop.f32.mrb[9].mxu0 }
 0x2bf   : > { %v1739_v40 = vadd.f32 %v1727_v23, %v1650_v27  ;;  %v1652_v32 = vpop.f32.mrb[10].mxu0 }
 0x2c0   : > { %1754 = vst [vmem:[%s2985_s9 + $0x40] sm:$0xff] %v1738_v39  ;;  %v1740_v41 = vadd.f32 %v1723_v44, %v1652_v32  ;;  %v1654_v48 = vpop.f32.mrb[11].mxu0 }
 0x2c1   : > { %1755 = vst [vmem:[%s2985_s9 + $0x48] sm:$0xff] %v1739_v40  ;;  %v1741_v49 = vadd.f32 %v1727_v23, %v1654_v48 }
 0x2c2   : > { %1756 = vst [vmem:[%s2985_s9 + $0x50] sm:$0xff] %v1740_v41 }
 0x2c3   : > { %1757 = vst [vmem:[%s2985_s9 + $0x58] sm:$0xff] %v1741_v49 }
 0x2c5   : > { %v1658_v29 = vpop.f32.mrb[12].mxu0 }
 0x2c6   : > { %v1742_v50 = vadd.f32 %v1723_v44, %v1658_v29  ;;  %v1660_v36 = vpop.f32.mrb[13].mxu0 }
 0x2c7   : > { %v1743_v51 = vadd.f32 %v1727_v23, %v1660_v36  ;;  %v1662_v52 = vpop.f32.mrb[14].mxu0 }
 0x2c8   : > { %1758 = vst [vmem:[%s2985_s9 + $0x60] sm:$0xff] %v1742_v50  ;;  %v1744_v54 = vadd.f32 %v1723_v44, %v1662_v52  ;;  %v1664_v8 = vpop.f32.mrb[15].mxu0 }
 0x2c9   : > { %1759 = vst [vmem:[%s2985_s9 + $0x68] sm:$0xff] %v1743_v51  ;;  %v1745_v55 = vadd.f32 %v1727_v23, %v1664_v8 }
 0x2ca   : > { %1760 = vst [vmem:[%s2985_s9 + $0x70] sm:$0xff] %v1744_v54 }
 0x2cb   : > { %1761 = vst [vmem:[%s2985_s9 + $0x78] sm:$0xff] %v1745_v55 }
 0x2cc   : > { %2527 = shalt.err (!%p2524_p11)
}
 0x2cd   : > { %s2528_s28 = scalar_lea.hbm %s3005_s14, 2048  ;;  %s2532_s6 = scalar_lea.hbm %s3064_s5, 4096 }
 0x2ce   : > { %p2529_p0 = scmp.ne.s32.totalorder %s3005_s14, %s2528_s28  ;;  %p2533_p6 = scmp.lt.u32.totalorder %s3005_s14, %s3064_s5 }
 0x2cf   : > { %p2534_p7 = scmp.lt.u32.totalorder %s2532_s6, %s2528_s28  ;;  %p2536_p8 = scmp.lt.u32.totalorder %s2528_s28, %s3005_s14 }
 0x2d0   : > { %p2530_p4 = pnand %p2529_p0, %p3081_p12 }
 0x2d1   : > { %p2535_p2 = por %p2534_p7, %p2533_p6 }
 0x2d2   : > { %p2531_p13 = pneg %p2530_p4 }
 0x2d3   : > { %p2537_p1 = por %p2536_p8, %p2535_p2 }
 0x2d5   : > { %p2538_p10 = pnand %p2537_p1, %p2531_p13 }
 0x2d7   : > { %2541 = shalt.err (!%p2538_p10)
}
 0x2d8   : > { %s2610_s16 = smov 256   ;;  %s2611_s7 = smov 16  }
 0x2d9   : > { %2081 = dma.vmem_to_hbm [thread:$0]  (%p3081_p12), %s3007_s13, 2048, %s3005_s14, %s1763_s21, %s2610_s16, %s2610_s16, %s2611_s7  }
 0x2da PF: > { %s1792_s27 = sand.u32 1, %s2580_s18   ;;  %p3082_p3 = scmp.ne.s32.totalorder %s3073_s29, 0 }
 0x2db   : > { %p3083_p5 = scmp.ge.s32.totalorder %s2600_s23, 2  ;;  %s1793_s15 = scalar_lea.sflag [#allocation5], %s1792_s27 }
 0x2dd   : > { %p2095_p9 = pnand %p3083_p5, %p3082_p3 }
 0x2df   : > { %2575 = dma.done.wait (!%p2095_p9), %s1793_s15, 2048  }
 0x2e0   : > { %2577 = vsyncadd (!%p2095_p9), %s1793_s15, 4294965248  ;;  %s22_s23 = sadd.s32 1, %s2600_s23   ;;  %s3084_s18 = smov %s2584_s19 }
 0x2e1   : > { %p19_p11 = scmp.ge.s32.totalorder %s22_s23, 4   ;;  %s3085_s19 = smov %s2588_s20 }
 0x2e2   : > { %s3086_s20 = smov %s2787_s17  ;;  %s3087_s21 = smov %s2596_s22 }
 0x2e3   : > { %s3088_s22 = smov %s3090_s12  ;;  %21 = sbr.rel (!%p19_p11) target bundleno = 7 (0x7), region = 106 }
 0x2ea   :  { %1798 = vsyncpa [#allocation4], 1 }
 0x2eb   :  { %1800 = vsyncpa [#allocation4 + $0x1], 1 }
 0x2ec   :  { %1801 = vsyncpa [#allocation7], 1 }
 0x2ed   :  { %1802 = vsyncpa [#allocation5], 1 }
 0x2ee   :  { %1804 = vsyncpa [#allocation5 + $0x1], 1 }

// kernel: tpu_custom_call.1
= control target key start
LH: loop header
LB: loop body
LE: loop exit
PB: predicated region body
PF: predicated region fallthrough
CT: control target
= control target key end

     0   :  { %10 = vsyncpa [#allocation4], 0  ;;  %s3059_s0 = inlined_call_operand.hbm [shape: bf16[128,256], index: 0, kind: input, shape index: {}]   ;;  %s3060_s1 = inlined_call_operand.hbm [shape: bf16[256,512], index: 1, kind: input, shape index: {}]   ;;  %s3061_s2 = inlined_call_operand.vmem [shape: f32[1,512], index: 2, kind: input, shape index: {}]   ;;  %s3062_s3 = inlined_call_operand.hbm [shape: bf16[512,256], index: 3, kind: input, shape index: {}]   ;;  %s3063_s4 = inlined_call_operand.vmem [shape: f32[1,256], index: 4, kind: input, shape index: {}]   ;;  %s3064_s5 = inlined_call_operand.hbm [shape: f32[128,256], index: 5, kind: output, shape index: {}]  }
   0x1   :  { %12 = vsyncpa [#allocation4 + $0x1], 0 }
   0x2   :  { %13 = vsyncpa [#allocation7], 0 }
   0x3   :  { %14 = vsyncpa [#allocation5], 0 }
   0x4   :  { %16 = vsyncpa [#allocation5 + $0x1], 0  ;;  %s2642_s18 = smov 0   ;;  %s2644_s19 = smov 0  }
   0x5   :  { %s2646_s20 = smov 0   ;;  %s2648_s21 = smov 0  }
   0x6   :  { %s2650_s22 = smov 0   ;;  %s2652_s23 = smov 0  }
   0x7 LB: > { %s1893_s24 = sadd.s32 4294967295, %s2600_s23   ;;  %s1894_s25 = sadd.s32 4294967294, %s2600_s23   ;;  %s2600_s23 = sphi %s2652_s23, %s22_s23   ;;  %s2596_s22 = sphi %s2650_s22, %s3088_s22   ;;  %s2592_s21 = sphi %s2648_s21, %s3087_s21   ;;  %s2588_s20 = sphi %s2646_s20, %s3086_s20   ;;  %s2584_s19 = sphi %s2644_s19, %s3085_s19   ;;  %s2580_s18 = sphi %s2642_s18, %s3084_s18  }
   0x8   : > { %p54_p0 = scmp.ne.s32.totalorder %s2584_s19, %s2580_s18  ;;  %p2676_p1 = scmp.eq.s32.totalorder %s1893_s24, 0 }
   0x9   : > { %p2680_p2 = scmp.eq.s32.totalorder %s1893_s24, 1  ;;  %p183_p3 = scmp.eq.s32.totalorder %s1894_s25, 1 }
   0xa   : > { %s3070_s26 = scalar_select %p2676_p1, 1, 0 }
   0xb   : > { %p2686_p4 = por %p2676_p1, %p54_p0  ;;  %p1895_p5 = scmp.ge.s32.totalorder %s2600_s23, 1 }
   0xc   : > { %p2691_p6 = por %p183_p3, %p54_p0  ;;  %p190_p7 = scmp.lt.s32.totalorder %s2600_s23, 3 }
   0xd   : > { %s3072_s28 = scalar_select %p2686_p4, 1, 0 }
   0xe   : > { %s3073_s29 = scalar_select %p2691_p6, 1, 0 }
   0xf   : > { %p2696_p8 = pnand %p1895_p5, %p190_p7  ;;  %s2602_s6 = smov [#allocation6]  }
  0x10   : > { %s205_s7 = sshll.u32 %s2602_s6, 4  ;;  %s2603_s9 = smov [#allocation8]   ;;  %s2700_s7 = int_to_ptr.vmem [resolvable:$true] %s205_s7 }
  0x11   : > { %p2083_p9 = pneg %p2696_p8  ;;  %s230_s10 = sshll.u32 %s2603_s9, 4  ;;  %s2711_s10 = int_to_ptr.vmem [resolvable:$true] %s230_s10 }
  0x12   : > { %s2428_s13 = scalar_lea.hbm %s3060_s1, 8192 }
  0x13   : > { %p2707_p11 = pnand %p2083_p9, %p2676_p1  ;;  %p2429_p12 = scmp.ne.s32.totalorder %s3060_s1, %s2428_s13 }
  0x14   : > { %p2435_p5 = scmp.lt.u32.totalorder %s2428_s13, %s3060_s1 }
  0x15   : > { %p2430_p13 = pneg %p2707_p11 }
  0x17   : > { %p2431_p0 = pnand %p2430_p13, %p2429_p12 }
  0x19   : > { %p2432_p3 = pneg %p2431_p0 }
  0x1b   : > { %p2437_p7 = pnand %p2435_p5, %p2432_p3 }
  0x1d   : > { %2440 = shalt.err (!%p2437_p7)
}
  0x1e   : > { %s2441_s24 = scalar_lea.vmem %s2700_s7, 8192  ;;  %p2449_p1 = scmp.lt.s32.totalorder %s2700_s7, %s2700_s7 }
  0x1f   : > { %p2442_p9 = scmp.ne.s32.totalorder %s2700_s7, %s2441_s24  ;;  %p2450_p12 = scmp.lt.s32.totalorder %s2441_s24, %s2441_s24 }
  0x21   : > { %p2444_p10 = pnand %p2442_p9, %p2430_p13  ;;  %p2451_p0 = por %p2450_p12, %p2449_p1 }
  0x23   : > { %p2445_p6 = pneg %p2444_p10 }
  0x25   : > { %p2452_p4 = pnand %p2451_p0, %p2445_p6 }
  0x27   : > { %2455 = shalt.err (!%p2452_p4)
}
  0x28   : > { %s2604_s25 = smov 256   ;;  %s2605_s6 = smov 16  }
  0x29   : > { %2086 = dma.hbm_to_vmem [thread:$0]  (!%p2707_p11), %s3060_s1, 8192, %s2700_s7, [#allocation7], %s2604_s25, %s2604_s25, %s2605_s6  }
  0x2a   : > { %s2456_s14 = scalar_lea.hbm %s3062_s3, 8192 }
  0x2b   : > { %p2457_p1 = scmp.ne.s32.totalorder %s3062_s3, %s2456_s14  ;;  %p2463_p10 = scmp.lt.u32.totalorder %s2456_s14, %s3062_s3 }
  0x2d   : > { %p2459_p4 = pnand %p2457_p1, %p2430_p13 }
  0x2f   : > { %p2460_p6 = pneg %p2459_p4 }
  0x31   : > { %p2465_p3 = pnand %p2463_p10, %p2460_p6 }
  0x33   : > { %2468 = shalt.err (!%p2465_p3)
}
  0x34   : > { %s2469_s7 = scalar_lea.vmem %s2711_s10, 8192  ;;  %p2477_p12 = scmp.lt.s32.totalorder %s2711_s10, %s2711_s10 }
  0x35   : > { %p2470_p5 = scmp.ne.s32.totalorder %s2711_s10, %s2469_s7  ;;  %p2478_p0 = scmp.lt.s32.totalorder %s2469_s7, %s2469_s7 }
  0x37   : > { %p2472_p7 = pnand %p2470_p5, %p2430_p13  ;;  %p2479_p1 = por %p2478_p0, %p2477_p12 }
  0x39   : > { %p2473_p9 = pneg %p2472_p7 }
  0x3b   : > { %p2480_p4 = pnand %p2479_p1, %p2473_p9 }
  0x3d   : > { %2483 = shalt.err (!%p2480_p4)
}
  0x3e   : > { %s3068_s25 = smov 128   ;;  %s2607_s6 = smov 8  }
  0x3f   : > { %2089 = dma.hbm_to_vmem [thread:$0]  (!%p2707_p11), %s3062_s3, 8192, %s2711_s10, [#allocation7], %s3068_s25, %s3068_s25, %s2607_s6  }
  0x40   : > { %s34_s12 = sadd.s32 1, %s2596_s22  ;;  %s41_s13 = sadd.s32 1, %s2588_s20 }
  0x41   : > { %p36_p13 = scmp.ge.s32.totalorder %s34_s12, 2  ;;  %p48_p6 = scmp.ne.s32.totalorder %s2588_s20, %s2584_s19 }
  0x42   : > { %p49_p10 = scmp.eq.s32.totalorder %s2600_s23, 0  ;;  %p2100_p3 = scmp.lt.s32.totalorder %s2600_s23, 2 }
  0x43   : > { %s3090_s12 = smov (%p36_p13, %s34_s12), 0  ;;  %p2778_p7 = por %p2680_p2, %p48_p6 }
  0x44   : > { %p50_p5 = por %p49_p10, %p48_p6  ;;  %s38_s14 = ssub.s32 %s2596_s22, %s3090_s12 }
  0x45   : > { %s3076_s8 = scalar_select %p2778_p7, 1, 0 }
  0x46   : > { %s247_s15 = sand.u32 1, %s2588_s20   ;;  %p39_p9 = scmp.eq.s32.totalorder %s38_s14, 0 }
  0x47   : > { %s1900_s10 = sshll.u32 %s247_s15, 6  ;;  %s2052_s16 = sshll.u32 %s2596_s22, 10 }
  0x48   : > { %s2787_s17 = scalar_select %p39_p9, %s2588_s20, %s41_s13  }
  0x49   : > { %s2792_s9 = scalar_lea.hbm %s3059_s0, %s2052_s16  ;;  %s251_s27 = scalar_lea.vmem [#allocation3], %s1900_s10 }
  0x4a   : > { %s259_s11 = sshll.u32 %s251_s27, 4  ;;  %p2796_p2 = pnand %p2100_p3, %p50_p5  ;;  %s2800_s11 = int_to_ptr.vmem [resolvable:$true] %s259_s11 }
  0x4b   : > { %s2802_s13 = scalar_lea.sflag [#allocation4], %s247_s15  ;;  %s2484_s14 = scalar_lea.hbm %s2792_s9, 1024 }
  0x4c   : > { %p2485_p11 = scmp.ne.s32.totalorder %s2792_s9, %s2484_s14  ;;  %p2486_p12 = pneg %p2796_p2 }
  0x4d   : > { %s2489_s24 = scalar_lea.hbm %s3059_s0, 2048  ;;  %p2490_p4 = scmp.lt.u32.totalorder %s2792_s9, %s3059_s0 }
  0x4e   : > { %p2487_p0 = pnand %p2486_p12, %p2485_p11  ;;  %p2491_p13 = scmp.lt.u32.totalorder %s2489_s24, %s2484_s14 }
  0x4f   : > { %p2493_p10 = scmp.lt.u32.totalorder %s2484_s14, %s2792_s9 }
  0x50   : > { %p2488_p1 = pneg %p2487_p0  ;;  %p2492_p6 = por %p2491_p13, %p2490_p4 }
  0x52   : > { %p2494_p3 = por %p2493_p10, %p2492_p6 }
  0x54   : > { %p2495_p5 = pnand %p2494_p3, %p2488_p1 }
  0x56   : > { %2498 = shalt.err (!%p2495_p5)
}
  0x57   : > { %s2499_s15 = scalar_lea.vmem %s2800_s11, 1024  ;;  %s2608_s10 = smov [#allocation3]  }
  0x58   : > { %p2500_p9 = scmp.ne.s32.totalorder %s2800_s11, %s2499_s15  ;;  %s2504_s16 = sshll.u32 %s2608_s10, 4  ;;  %s2505_s16 = int_to_ptr.vmem [resolvable:$false] %s2504_s16 }
  0x59   : > { %s2506_s7 = scalar_lea.vmem %s2505_s16, 2048  ;;  %p2507_p7 = scmp.lt.s32.totalorder %s2800_s11, %s2505_s16 }
  0x5a   : > { %p2502_p11 = pnand %p2500_p9, %p2486_p12  ;;  %p2508_p4 = scmp.lt.s32.totalorder %s2506_s7, %s2499_s15 }
  0x5c   : > { %p2503_p0 = pneg %p2502_p11  ;;  %p2509_p13 = por %p2508_p4, %p2507_p7 }
  0x5e   : > { %p2510_p6 = pnand %p2509_p13, %p2503_p0 }
  0x60   : > { %2513 = shalt.err (!%p2510_p6)
}
  0x61   : > { %s3078_s14 = smov 128   ;;  %271 = sbr.rel (%p2696_p8) target bundleno = 730 (0x2da), region = 40 }
  0x62   : > { %2093 = dma.hbm_to_vmem [thread:$0]  (!%p2796_p2), %s2792_s9, 1024, %s2800_s11, %s2802_s13, %s3078_s14, %s3078_s14, %s2607_s6  }
  0x63   : > { %s2836_s24 = sand.u32 (!%p2696_p8), 1, %s2584_s19   ;;  %p3079_p7 = scmp.ne.s32.totalorder (!%p2696_p8), %s3072_s28, 0 }
  0x64   : > { %s1905_s27 = sshll.u32 (!%p2696_p8), %s2836_s24, 6  ;;  %s274_s15 = scalar_lea.sflag (!%p2696_p8), [#allocation4], %s2836_s24 }
  0x65   : > { %s2840_s10 = scalar_lea.vmem (!%p2696_p8), [#allocation3], %s1905_s27 }
  0x68   : > { %2567 = dma.done.wait (%p3079_p7), %s274_s15, 1024  }
  0x69   : > { %2569 = vsyncadd (%p3079_p7), %s274_s15, 4294966272  ;;  %p3080_p2 = scmp.ne.s32.totalorder %s3070_s26, 0 }
  0x6b   : > { %2571 = dma.done.wait (%p3080_p2), [#allocation7], 16384  }
  0x6c   : > { %2573 = vsyncadd (%p3080_p2), [#allocation7], 4294950912  ;;  %v2160_v0 = vld [vmem:[#allocation6 + $0x4] ss:$16 sps:$4 sm:$0xff]   ;;  %v2162_v1 = vld [vmem:[#allocation6] ss:$16 sps:$4 sm:$0xff]  }
  0x6d   : > { %799 = vmatprep.subr.bf16.mxu1 %v2160_v0  ;;  %v2163_v2 = vld [vmem:[#allocation6 + $0x24] ss:$16 sps:$4 sm:$0xff]   ;;  %v2165_v3 = vld [vmem:[#allocation6 + $0x20] ss:$16 sps:$4 sm:$0xff]   ;;  %v2213_v40 = vld [vmem:[#allocation6 + $0xc] ss:$16 sps:$4 sm:$0xff]  }
  0x6e   : > { %800 = vmatpush1.bf16.msra.mxu1 %v2162_v1  ;;  %v2166_v4 = vld [vmem:[#allocation6 + $0x44] ss:$16 sps:$4 sm:$0xff]   ;;  %v2168_v5 = vld [vmem:[#allocation6 + $0x40] ss:$16 sps:$4 sm:$0xff]   ;;  %v2211_v44 = vld [vmem:[#allocation6 + $0x8] ss:$16 sps:$4 sm:$0xff]  }
  0x6f   : > { %801 = vmatprep.subr.bf16.mxu1 %v2163_v2  ;;  %v2169_v6 = vld [vmem:[#allocation6 + $0x64] ss:$16 sps:$4 sm:$0xff]   ;;  %v2171_v7 = vld [vmem:[#allocation6 + $0x60] ss:$16 sps:$4 sm:$0xff]   ;;  %v2216_v46 = vld [vmem:[#allocation6 + $0x2c] ss:$16 sps:$4 sm:$0xff]  }
  0x70   : > { %v2172_v8 = vld [vmem:[#allocation6 + $0x84] ss:$16 sps:$4 sm:$0xff]   ;;  %v2174_v9 = vld [vmem:[#allocation6 + $0x80] ss:$16 sps:$4 sm:$0xff]   ;;  %v2214_v49 = vld [vmem:[#allocation6 + $0x28] ss:$16 sps:$4 sm:$0xff]  }
  0x71   : > { %v2175_v10 = vld [vmem:[#allocation6 + $0xa4] ss:$16 sps:$4 sm:$0xff]   ;;  %v2177_v11 = vld [vmem:[#allocation6 + $0xa0] ss:$16 sps:$4 sm:$0xff]   ;;  %v2219_v50 = vld [vmem:[#allocation6 + $0x4c] ss:$16 sps:$4 sm:$0xff]  }
  0x72   : > { %802 = vmatpush1.bf16.msra.mxu1 %v2165_v3  ;;  %v2178_v12 = vld [vmem:[#allocation6 + $0xc4] ss:$16 sps:$4 sm:$0xff]   ;;  %v2180_v14 = vld [vmem:[#allocation6 + $0xc0] ss:$16 sps:$4 sm:$0xff]   ;;  %v2217_v54 = vld [vmem:[#allocation6 + $0x48] ss:$16 sps:$4 sm:$0xff]  }
  0x73   : > { %803 = vmatprep.subr.bf16.mxu1 %v2166_v4  ;;  %v2851_v13 = vld [vmem:[%s2840_s10 + $0x4] ss:$8 sps:$4 sm:$0xff]   ;;  %v2183_v16 = vld [vmem:[#allocation6 + $0xe0] ss:$16 sps:$4 sm:$0xff]   ;;  %v2271_v31 = vld [vmem:[#allocation8 + $0x14] ss:$8 sps:$4 sm:$0xff]  }
  0x74   : > { %v2181_v15 = vld [vmem:[#allocation6 + $0xe4] ss:$16 sps:$4 sm:$0xff]   ;;  %831 = vmatprep.mubr.bf16.mxu1 %v2851_v13  ;;  %v2186_v18 = vld [vmem:[#allocation6 + $0x100] ss:$16 sps:$4 sm:$0xff]   ;;  %v2222_v56 = vld [vmem:[#allocation6 + $0x6c] ss:$16 sps:$4 sm:$0xff]  }
  0x75   : > { %v2184_v17 = vld [vmem:[#allocation6 + $0x104] ss:$16 sps:$4 sm:$0xff]   ;;  %v2189_v20 = vld [vmem:[#allocation6 + $0x120] ss:$16 sps:$4 sm:$0xff]   ;;  %v2220_v59 = vld [vmem:[#allocation6 + $0x68] ss:$16 sps:$4 sm:$0xff]  }
  0x76   : > { %804 = vmatpush1.bf16.msra.mxu1 %v2168_v5  ;;  %v2187_v19 = vld [vmem:[#allocation6 + $0x124] ss:$16 sps:$4 sm:$0xff]   ;;  %v2192_v22 = vld [vmem:[#allocation6 + $0x140] ss:$16 sps:$4 sm:$0xff]   ;;  %v2225_v60 = vld [vmem:[#allocation6 + $0x8c] ss:$16 sps:$4 sm:$0xff]  }
  0x77   : > { %805 = vmatprep.subr.bf16.mxu1 %v2169_v6  ;;  %v2190_v21 = vld [vmem:[#allocation6 + $0x144] ss:$16 sps:$4 sm:$0xff]   ;;  %v2195_v24 = vld [vmem:[#allocation6 + $0x160] ss:$16 sps:$4 sm:$0xff]   ;;  %v2223_v0 = vld [vmem:[#allocation6 + $0x88] ss:$16 sps:$4 sm:$0xff]  }
  0x78   : > { %v2193_v23 = vld [vmem:[#allocation6 + $0x164] ss:$16 sps:$4 sm:$0xff]   ;;  %v2198_v26 = vld [vmem:[#allocation6 + $0x180] ss:$16 sps:$4 sm:$0xff]   ;;  %v2228_v2 = vld [vmem:[#allocation6 + $0xac] ss:$16 sps:$4 sm:$0xff]  }
  0x79   : > { %v2196_v25 = vld [vmem:[#allocation6 + $0x184] ss:$16 sps:$4 sm:$0xff]   ;;  %v2270_v29 = vld [vmem:[#allocation8] ss:$8 sps:$4 sm:$0xff]   ;;  %v2273_v33 = vld [vmem:[#allocation8 + $0x10] ss:$8 sps:$4 sm:$0xff]  }
  0x7a   : > { %806 = vmatpush1.bf16.msra.mxu1 %v2171_v7  ;;  %v2199_v27 = vld [vmem:[#allocation6 + $0x1a4] ss:$16 sps:$4 sm:$0xff]   ;;  %v2201_v30 = vld [vmem:[#allocation6 + $0x1a0] ss:$16 sps:$4 sm:$0xff]   ;;  %v2226_v5 = vld [vmem:[#allocation6 + $0xa8] ss:$16 sps:$4 sm:$0xff]  }
  0x7b   : > { %807 = vmatprep.subr.bf16.mxu1 %v2172_v8  ;;  %v2268_v28 = vld [vmem:[#allocation8 + $0x4] ss:$8 sps:$4 sm:$0xff]   ;;  %v2204_v35 = vld [vmem:[#allocation6 + $0x1c0] ss:$16 sps:$4 sm:$0xff]   ;;  %v2277_v38 = vld [vmem:[#allocation8 + $0x34] ss:$8 sps:$4 sm:$0xff]  }
  0x7c   : > { %1521 = vmatprep.subr.bf16.mxu0 %v2268_v28  ;;  %v2202_v32 = vld [vmem:[#allocation6 + $0x1c4] ss:$16 sps:$4 sm:$0xff]   ;;  %v2276_v37 = vld [vmem:[#allocation8 + $0x20] ss:$8 sps:$4 sm:$0xff]   ;;  %v2279_v41 = vld [vmem:[#allocation8 + $0x30] ss:$8 sps:$4 sm:$0xff]  }
  0x7d   : > { %1522 = vmatpush1.bf16.msra.mxu0 %v2270_v29  ;;  %v2274_v34 = vld [vmem:[#allocation8 + $0x24] ss:$8 sps:$4 sm:$0xff]   ;;  %v2207_v39 = vld [vmem:[#allocation6 + $0x1e0] ss:$16 sps:$4 sm:$0xff]   ;;  %v2858_v45 = vld [vmem:[%s2840_s10 + $0x14] ss:$8 sps:$4 sm:$0xff]  }
  0x7e   : > { %808 = vmatpush1.bf16.msra.mxu1 %v2174_v9  ;;  %1523 = vmatprep.subr.bf16.mxu0 %v2271_v31  ;;  %v2205_v36 = vld [vmem:[#allocation6 + $0x1e4] ss:$16 sps:$4 sm:$0xff]   ;;  %v2855_v42 = vld [vmem:[%s2840_s10] ss:$8 sps:$4 sm:$0xff]   ;;  %v2285_v51 = vld [vmem:[#allocation8 + $0x50] ss:$8 sps:$4 sm:$0xff]  }
  0x7f   : > { %809 = vmatprep.subr.bf16.mxu1 %v2175_v10  ;;  %v2280_v43 = vld [vmem:[#allocation8 + $0x44] ss:$8 sps:$4 sm:$0xff]   ;;  %v2282_v47 = vld [vmem:[#allocation8 + $0x40] ss:$8 sps:$4 sm:$0xff]   ;;  %v2283_v48 = vld [vmem:[#allocation8 + $0x54] ss:$8 sps:$4 sm:$0xff]  }
  0x80   : > { %v2286_v52 = vld [vmem:[#allocation8 + $0x64] ss:$8 sps:$4 sm:$0xff]   ;;  %v2863_v53 = vld [vmem:[%s2840_s10 + $0x10] ss:$8 sps:$4 sm:$0xff]   ;;  %v2288_v57 = vld [vmem:[#allocation8 + $0x60] ss:$8 sps:$4 sm:$0xff]  }
  0x81   : > { %1524 = vmatpush1.bf16.msra.mxu0 %v2273_v33  ;;  %v2866_v55 = vld [vmem:[%s2840_s10 + $0x24] ss:$8 sps:$4 sm:$0xff]   ;;  %v2289_v58 = vld [vmem:[#allocation8 + $0x74] ss:$8 sps:$4 sm:$0xff]   ;;  %v2291_v61 = vld [vmem:[#allocation8 + $0x70] ss:$8 sps:$4 sm:$0xff]  }
  0x82   : > { %810 = vmatpush1.bf16.msra.mxu1 %v2177_v11  ;;  %1525 = vmatprep.subr.bf16.mxu0 %v2274_v34  ;;  %v2292_v62 = vld [vmem:[#allocation8 + $0x84] ss:$8 sps:$4 sm:$0xff]   ;;  %v2871_v63 = vld [vmem:[%s2840_s10 + $0x20] ss:$8 sps:$4 sm:$0xff]   ;;  %v2874_v1 = vld [vmem:[%s2840_s10 + $0x34] ss:$8 sps:$4 sm:$0xff]  }
  0x83   : > { %811 = vmatprep.subr.bf16.mxu1 %v2178_v12  ;;  %v2294_v3 = vld [vmem:[#allocation8 + $0x80] ss:$8 sps:$4 sm:$0xff]   ;;  %v2295_v4 = vld [vmem:[#allocation8 + $0x94] ss:$8 sps:$4 sm:$0xff]   ;;  %v2297_v7 = vld [vmem:[#allocation8 + $0x90] ss:$8 sps:$4 sm:$0xff]  }
  0x84   : > { %v2234_v6 = vld [vmem:[#allocation6 + $0xcc] ss:$16 sps:$4 sm:$0xff]   ;;  %v2249_v8 = vld [vmem:[%s2840_s10 + $0x30] ss:$8 sps:$4 sm:$0xff]   ;;  %v2300_v29 = vld [vmem:[#allocation8 + $0xa0] ss:$8 sps:$4 sm:$0xff]  }
  0x85   : > { %1526 = vmatpush1.bf16.msra.mxu0 %v2276_v37  ;;  %v2232_v9 = vld [vmem:[#allocation6 + $0xc8] ss:$16 sps:$4 sm:$0xff]   ;;  %v2237_v10 = vld [vmem:[#allocation6 + $0xec] ss:$16 sps:$4 sm:$0xff]   ;;  %s1908_s6 = sshll.u32 %s2836_s24, 7  ;;  %s2054_s11 = sshll.u32 %s2592_s21, 11 }
  0x86   : > { %812 = vmatpush1.bf16.msra.mxu1 %v2180_v14  ;;  %1527 = vmatprep.subr.bf16.mxu0 %v2277_v38  ;;  %v2235_v11 = vld [vmem:[#allocation6 + $0xe8] ss:$16 sps:$4 sm:$0xff]   ;;  %v2243_v12 = vld [vmem:[#allocation6 + $0x10c] ss:$16 sps:$4 sm:$0xff]   ;;  %s2985_s9 = scalar_lea.vmem [#allocation9], %s1908_s6  ;;  %s3005_s14 = scalar_lea.hbm %s3064_s5, %s2054_s11 }
  0x87   : > { %813 = vmatprep.subr.bf16.mxu1 %v2181_v15  ;;  %v2241_v14 = vld [vmem:[#allocation6 + $0x108] ss:$16 sps:$4 sm:$0xff]   ;;  %v2246_v15 = vld [vmem:[#allocation6 + $0x12c] ss:$16 sps:$4 sm:$0xff]   ;;  %s1777_s13 = sshll.u32 %s2985_s9, 4  ;;  %s1763_s21 = scalar_lea.sflag [#allocation5], %s2836_s24  ;;  %s3007_s13 = int_to_ptr.vmem [resolvable:$true] %s1777_s13 }
  0x88   : > { %v2298_v28 = vld [vmem:[#allocation8 + $0xa4] ss:$8 sps:$4 sm:$0xff]   ;;  %v2303_v31 = vld [vmem:[#allocation8 + $0xb0] ss:$8 sps:$4 sm:$0xff]   ;;  %v2306_v33 = vld [vmem:[#allocation8 + $0xc0] ss:$8 sps:$4 sm:$0xff]  }
  0x89   : > { %1528 = vmatpush1.bf16.msra.mxu0 %v2279_v41  ;;  %v2307_v34 = vld [vmem:[#allocation8 + $0xd4] ss:$8 sps:$4 sm:$0xff]   ;;  %v2312_v37 = vld [vmem:[#allocation8 + $0xe0] ss:$8 sps:$4 sm:$0xff]   ;;  %v419_v41 = vlaneseq  ;;  %s2514_s27 = scalar_lea.vmem %s3007_s13, 2048  ;;  %p3081_p12 = scmp.ne.s32.totalorder %s3076_s8, 0 }
  0x8a   : > { %814 = vmatpush1.bf16.msra.mxu1 %v2183_v16  ;;  %1529 = vmatprep.subr.bf16.mxu0 %v2280_v43  ;;  %v2244_v16 = vld [vmem:[#allocation6 + $0x128] ss:$16 sps:$4 sm:$0xff]   ;;  %v2313_v38 = vld [vmem:[#allocation8 + $0xf4] ss:$8 sps:$4 sm:$0xff]   ;;  %p2515_p8 = scmp.ne.s32.totalorder %s3007_s13, %s2514_s27  ;;  %s2609_s15 = smov [#allocation9]  }
  0x8b   : > { %815 = vmatprep.subr.bf16.mxu1 %v2184_v17  ;;  %v2252_v17 = vld [vmem:[#allocation6 + $0x14c] ss:$16 sps:$4 sm:$0xff]   ;;  %s2518_s10 = sshll.u32 %s2609_s15, 4  ;;  %s2519_s10 = int_to_ptr.vmem [resolvable:$false] %s2518_s10 }
  0x8c   : > { %p2516_p1 = pnand %p2515_p8, %p3081_p12  ;;  %s2520_s26 = scalar_lea.vmem %s2519_s10, 4096 }
  0x8d   : > { %1530 = vmatpush1.bf16.msra.mxu0 %v2282_v47  ;;  %p2521_p3 = scmp.lt.s32.totalorder %s3007_s13, %s2519_s10  ;;  %p2522_p5 = scmp.lt.s32.totalorder %s2520_s26, %s2514_s27 }
  0x8e   : > { %816 = vmatpush1.bf16.msra.mxu1 %v2186_v18  ;;  %1531 = vmatprep.subr.bf16.mxu0 %v2283_v48  ;;  %v2250_v18 = vld [vmem:[#allocation6 + $0x148] ss:$16 sps:$4 sm:$0xff]   ;;  %p2517_p10 = pneg %p2516_p1 }
  0x8f   : > { %817 = vmatprep.subr.bf16.mxu1 %v2187_v19  ;;  %v2255_v19 = vld [vmem:[#allocation6 + $0x16c] ss:$16 sps:$4 sm:$0xff]   ;;  %p2523_p9 = por %p2522_p5, %p2521_p3 }
  0x91   : > { %1532 = vmatpush1.bf16.msra.mxu0 %v2285_v51  ;;  %p2524_p11 = pnand %p2523_p9, %p2517_p10 }
  0x92   : > { %818 = vmatpush1.bf16.msra.mxu1 %v2189_v20  ;;  %1533 = vmatprep.subr.bf16.mxu0 %v2286_v52  ;;  %v2253_v20 = vld [vmem:[#allocation6 + $0x168] ss:$16 sps:$4 sm:$0xff]  }
  0x93   : > { %819 = vmatprep.subr.bf16.mxu1 %v2190_v21  ;;  %v2258_v21 = vld [vmem:[#allocation6 + $0x18c] ss:$16 sps:$4 sm:$0xff]  }
  0x95   : > { %1534 = vmatpush1.bf16.msra.mxu0 %v2288_v57 }
  0x96   : > { %820 = vmatpush1.bf16.msra.mxu1 %v2192_v22  ;;  %1535 = vmatprep.subr.bf16.mxu0 %v2289_v58  ;;  %v2261_v22 = vld [vmem:[#allocation6 + $0x1ac] ss:$16 sps:$4 sm:$0xff]  }
  0x97   : > { %821 = vmatprep.subr.bf16.mxu1 %v2193_v23  ;;  %v2259_v23 = vld [vmem:[#allocation6 + $0x1a8] ss:$16 sps:$4 sm:$0xff]  }
  0x99   : > { %1536 = vmatpush1.bf16.msra.mxu0 %v2291_v61 }
  0x9a   : > { %822 = vmatpush1.bf16.msra.mxu1 %v2195_v24  ;;  %1537 = vmatprep.subr.bf16.mxu0 %v2292_v62  ;;  %v2264_v24 = vld [vmem:[#allocation6 + $0x1cc] ss:$16 sps:$4 sm:$0xff]  }
  0x9b   : > { %823 = vmatprep.subr.bf16.mxu1 %v2196_v25  ;;  %v2262_v25 = vld [vmem:[#allocation6 + $0x1c8] ss:$16 sps:$4 sm:$0xff]  }
  0x9d   : > { %1538 = vmatpush1.bf16.msra.mxu0 %v2294_v3 }
  0x9e   : > { %824 = vmatpush1.bf16.msra.mxu1 %v2198_v26  ;;  %1539 = vmatprep.subr.bf16.mxu0 %v2295_v4  ;;  %v2267_v26 = vld [vmem:[#allocation6 + $0x1ec] ss:$16 sps:$4 sm:$0xff]  }
  0x9f   : > { %825 = vmatprep.subr.bf16.mxu1 %v2199_v27  ;;  %v2265_v27 = vld [vmem:[#allocation6 + $0x1e8] ss:$16 sps:$4 sm:$0xff]  }
  0xa1   : > { %1540 = vmatpush1.bf16.msra.mxu0 %v2297_v7 }
  0xa2   : > { %826 = vmatpush1.bf16.msra.mxu1 %v2201_v30  ;;  %1541 = vmatprep.subr.bf16.mxu0 %v2298_v28  ;;  %v2301_v30 = vld [vmem:[#allocation8 + $0xb4] ss:$8 sps:$4 sm:$0xff]  }
  0xa3   : > { %827 = vmatprep.subr.bf16.mxu1 %v2202_v32  ;;  %v2304_v32 = vld [vmem:[#allocation8 + $0xc4] ss:$8 sps:$4 sm:$0xff]  }
  0xa5   : > { %1542 = vmatpush1.bf16.msra.mxu0 %v2300_v29 }
  0xa6   : > { %828 = vmatpush1.bf16.msra.mxu1 %v2204_v35  ;;  %1543 = vmatprep.subr.bf16.mxu0 %v2301_v30  ;;  %v2309_v35 = vld [vmem:[#allocation8 + $0xd0] ss:$8 sps:$4 sm:$0xff]  }
  0xa7   : > { %829 = vmatprep.subr.bf16.mxu1 %v2205_v36  ;;  %v2310_v36 = vld [vmem:[#allocation8 + $0xe4] ss:$8 sps:$4 sm:$0xff]  }
  0xa9   : > { %1544 = vmatpush1.bf16.msra.mxu0 %v2303_v31 }
  0xaa   : > { %830 = vmatpush1.bf16.msra.mxu1 %v2207_v39  ;;  %1545 = vmatprep.subr.bf16.mxu0 %v2304_v32  ;;  %v2315_v39 = vld [vmem:[#allocation8 + $0xf0] ss:$8 sps:$4 sm:$0xff]  }
  0xab   : > { %872 = vmatprep.subr.bf16.mxu1 %v2213_v40  ;;  %v2318_v40 = vld [vmem:[#allocation8 + $0x104] ss:$8 sps:$4 sm:$0xff]  }
  0xad   : > { %832 = vmatmul.mubr.bf16.vlgmr.msra.gmra.mrb[0].mxu1 %v2855_v42  ;;  %1546 = vmatpush1.bf16.msra.mxu0 %v2306_v33 }
  0xae   : > { %873 = vmatpush1.bf16.msra.mxu1 %v2211_v44  ;;  %841 = vmatprep.mubr.bf16.mxu1 %v2858_v45  ;;  %v2892_v44 = vld [vmem:[%s3061_s2] sm:$0xf] }
  0xaf   : > { %874 = vmatprep.subr.bf16.mxu1 %v2216_v46  ;;  %1547 = vmatprep.subr.bf16.mxu0 %v2307_v34 }
  0xb1   : > { %1548 = vmatpush1.bf16.msra.mxu0 %v2309_v35 }
  0xb2   : > { %875 = vmatpush1.bf16.msra.mxu1 %v2214_v49  ;;  %1549 = vmatprep.subr.bf16.mxu0 %v2310_v36 }
  0xb3   : > { %876 = vmatprep.subr.bf16.mxu1 %v2219_v50 }
  0xb5   : > { %842 = vmatmul.mubr.bf16.gmra.mrb[4].mxu1 %v2863_v53  ;;  %1550 = vmatpush1.bf16.msra.mxu0 %v2312_v37 }
  0xb6   : > { %877 = vmatpush1.bf16.msra.mxu1 %v2217_v54  ;;  %851 = vmatprep.mubr.bf16.mxu1 %v2866_v55 }
  0xb7   : > { %878 = vmatprep.subr.bf16.mxu1 %v2222_v56  ;;  %1551 = vmatprep.subr.bf16.mxu0 %v2313_v38 }
  0xb9   : > { %1552 = vmatpush1.bf16.msra.mxu0 %v2315_v39 }
  0xba   : > { %879 = vmatpush1.bf16.msra.mxu1 %v2220_v59  ;;  %1594 = vmatprep.subr.bf16.mxu0 %v2318_v40  ;;  %v2316_v40 = vld [vmem:[#allocation8 + $0x100] ss:$8 sps:$4 sm:$0xff]  }
  0xbb   : > { %880 = vmatprep.subr.bf16.mxu1 %v2225_v60 }
  0xbd   : > { %852 = vmatmul.mubr.bf16.gmra.mrb[8].mxu1 %v2871_v63 }
  0xbe   : > { %881 = vmatpush1.bf16.msra.mxu1 %v2223_v0  ;;  %861 = vmatprep.mubr.bf16.mxu1 %v2874_v1 }
  0xbf   : > { %882 = vmatprep.subr.bf16.mxu1 %v2228_v2 }
  0xc2   : > { %883 = vmatpush1.bf16.msra.mxu1 %v2226_v5 }
  0xc3   : > { %884 = vmatprep.subr.bf16.mxu1 %v2234_v6 }
  0xc5   : > { %862 = vmatmul.mubr.bf16.gmra.mrb[12].mxu1 %v2249_v8 }
  0xc6   : > { %885 = vmatpush1.bf16.msra.mxu1 %v2232_v9  ;;  %904 = vmatprep.mubr.bf16.mxu1 %v2851_v13  ;;  %v2256_v13 = vld [vmem:[#allocation6 + $0x188] ss:$16 sps:$4 sm:$0xff]  }
  0xc7   : > { %886 = vmatprep.subr.bf16.mxu1 %v2237_v10 }
  0xca   : > { %887 = vmatpush1.bf16.msra.mxu1 %v2235_v11 }
  0xcb   : > { %888 = vmatprep.subr.bf16.mxu1 %v2243_v12 }
  0xce   : > { %889 = vmatpush1.bf16.msra.mxu1 %v2241_v14 }
  0xcf   : > { %890 = vmatprep.subr.bf16.mxu1 %v2246_v15 }
  0xd2   : > { %891 = vmatpush1.bf16.msra.mxu1 %v2244_v16 }
  0xd3   : > { %892 = vmatprep.subr.bf16.mxu1 %v2252_v17 }
  0xd6   : > { %893 = vmatpush1.bf16.msra.mxu1 %v2250_v18 }
  0xd7   : > { %894 = vmatprep.subr.bf16.mxu1 %v2255_v19 }
  0xda   : > { %895 = vmatpush1.bf16.msra.mxu1 %v2253_v20 }
  0xdb   : > { %896 = vmatprep.subr.bf16.mxu1 %v2258_v21 }
  0xde   : > { %897 = vmatpush1.bf16.msra.mxu1 %v2256_v13 }
  0xdf   : > { %898 = vmatprep.subr.bf16.mxu1 %v2261_v22 }
  0xe2   : > { %899 = vmatpush1.bf16.msra.mxu1 %v2259_v23 }
  0xe3   : > { %900 = vmatprep.subr.bf16.mxu1 %v2264_v24 }
  0xe6   : > { %901 = vmatpush1.bf16.msra.mxu1 %v2262_v25 }
  0xe7   : > { %902 = vmatprep.subr.bf16.mxu1 %v2267_v26 }
  0xea   : > { %903 = vmatpush1.bf16.msra.mxu1 %v2265_v27 }
  0xed   : > { %905 = vmatmul.mubr.bf16.vlgmr.msra.gmra.mrb[16].mxu1 %v2855_v42  ;;  %v2886_v42 = vshrl.u32 %v419_v41, 7 }
  0xee   : > { %914 = vmatprep.mubr.bf16.mxu1 %v2858_v45 }
  0xef   : > { %v421_v43 = vsub.s32 0, %v2886_v42  ;;  %v425_v45 = vsub.s32 1, %v2886_v42 }
  0xf1   : > { %v2898_v46 = vrot.slane %v2892_v44, %v421_v43  ;;  %v2903_v47 = vrot.slane %v2892_v44, %v425_v45 }
  0xf5   : > { %915 = vmatmul.mubr.bf16.gmra.mrb[20].mxu1 %v2863_v53 }
  0xf6   : > { %924 = vmatprep.mubr.bf16.mxu1 %v2866_v55 }
  0xfd   : > { %925 = vmatmul.mubr.bf16.gmra.mrb[24].mxu1 %v2871_v63 }
  0xfe   : > { %934 = vmatprep.mubr.bf16.mxu1 %v2874_v1 }
 0x105   : > { %935 = vmatmul.mubr.bf16.gmra.mrb[28].mxu1 %v2249_v8 }
 0x180   : > { %v833_v48 = vpop.f32.mrb[0].mxu1 }
 0x181   : > { %v834_v49 = vadd.f32 %v833_v48, %v2898_v46  ;;  %v835_v50 = vpop.f32.mrb[1].mxu1 }
 0x182   : > { %v836_v51 = vadd.f32 %v835_v50, %v2903_v47  ;;  %v837_v52 = vpop.f32.mrb[2].mxu1 }
 0x183   : > { %v977_v53 = vmul.f32 0.70710677, %v834_v49  ;;  %v838_v54 = vadd.f32 %v837_v52, %v2898_v46  ;;  %v839_v55 = vpop.f32.mrb[3].mxu1  ;;  %v945_v18 = vmul.f32 0.5, %v834_v49 }
 0x184   : > { %v978_v56 = vmul.f32 0.70710677, %v836_v51  ;;  %v840_v57 = vadd.f32 %v839_v55, %v2903_v47  ;;  %v946_v22 = vmul.f32 0.5, %v836_v51  ;;  %v2321_v51 = vld [vmem:[#allocation8 + $0x114] ss:$8 sps:$4 sm:$0xff]  }
 0x185   : > { %2364 = verf.f32 %v977_v53  ;;  %v981_v58 = vmul.f32 0.70710677, %v838_v54  ;;  %v949_v19 = vmul.f32 0.5, %v838_v54 }
 0x186   : > { %2366 = verf.f32 %v978_v56  ;;  %v982_v59 = vmul.f32 0.70710677, %v840_v57  ;;  %v950_v23 = vmul.f32 0.5, %v840_v57 }
 0x187   : > { %2368 = verf.f32 %v981_v58 }
 0x188   : > { %2370 = verf.f32 %v982_v59  ;;  %v843_v60 = vpop.f32.mrb[4].mxu1 }
 0x189   : > { %v844_v61 = vadd.f32 %v843_v60, %v2898_v46  ;;  %v845_v62 = vpop.f32.mrb[5].mxu1 }
 0x18a   : > { %v846_v63 = vadd.f32 %v845_v62, %v2903_v47  ;;  %v847_v0 = vpop.f32.mrb[6].mxu1 }
 0x18b   : > { %v985_v1 = vmul.f32 0.70710677, %v844_v61  ;;  %v848_v2 = vadd.f32 %v847_v0, %v2898_v46  ;;  %v849_v3 = vpop.f32.mrb[7].mxu1  ;;  %v953_v34 = vmul.f32 0.5, %v844_v61 }
 0x18c   : > { %v986_v4 = vmul.f32 0.70710677, %v846_v63  ;;  %v850_v5 = vadd.f32 %v849_v3, %v2903_v47  ;;  %v954_v38 = vmul.f32 0.5, %v846_v63 }
 0x18d   : > { %2372 = verf.f32 %v985_v1  ;;  %v989_v6 = vmul.f32 0.70710677, %v848_v2  ;;  %v957_v50 = vmul.f32 0.5, %v848_v2  ;;  %v2319_v1 = vld [vmem:[#allocation8 + $0x110] ss:$8 sps:$4 sm:$0xff]  }
 0x18e   : > { %2374 = verf.f32 %v986_v4  ;;  %v990_v7 = vmul.f32 0.70710677, %v850_v5  ;;  %v958_v55 = vmul.f32 0.5, %v850_v5  ;;  %v2324_v5 = vld [vmem:[#allocation8 + $0x124] ss:$8 sps:$4 sm:$0xff]  }
 0x18f   : > { %v2365_v8 = vpop.eup %2364  ;;  %2376 = verf.f32 %v989_v6 }
 0x190   : > { %v2367_v9 = vpop.eup %2366  ;;  %v1041_v10 = vadd.f32 1.0, %v2365_v8  ;;  %2378 = verf.f32 %v990_v7  ;;  %v853_v11 = vpop.f32.mrb[8].mxu1 }
 0x191   : > { %v2369_v12 = vpop.eup %2368  ;;  %v1042_v14 = vadd.f32 1.0, %v2367_v9  ;;  %v2914_v15 = vadd.f32 %v853_v11, %v2898_v46  ;;  %v855_v16 = vpop.f32.mrb[9].mxu1 }
 0x192   : > { %v2371_v17 = vpop.eup %2370  ;;  %v1045_v20 = vadd.f32 1.0, %v2369_v12  ;;  %v2917_v21 = vadd.f32 %v855_v16, %v2903_v47  ;;  %v857_v13 = vpop.f32.mrb[10].mxu1  ;;  %v1073_v27 = vmul.f32 %v1041_v10, %v945_v18  ;;  %v2322_v16 = vld [vmem:[#allocation8 + $0x120] ss:$8 sps:$4 sm:$0xff]  }
 0x193   : > { %v1046_v24 = vadd.f32 1.0, %v2371_v17  ;;  %v993_v25 = vmul.f32 0.70710677, %v2914_v15  ;;  %v859_v26 = vpop.f32.mrb[11].mxu1  ;;  %v858_v30 = vadd.f32 %v857_v13, %v2898_v46  ;;  %v1074_v31 = vmul.f32 %v1042_v14, %v946_v22 }
 0x194   : > { %v1077_v28 = vmul.f32 %v1045_v20, %v949_v19  ;;  %v994_v29 = vmul.f32 0.70710677, %v2917_v21  ;;  %v860_v33 = vadd.f32 %v859_v26, %v2903_v47  ;;  %v961_v14 = vmul.f32 0.5, %v2914_v15 }
 0x195   : > { %v1078_v32 = vmul.f32 %v1046_v24, %v950_v23  ;;  %2380 = verf.f32 %v993_v25  ;;  %v997_v36 = vmul.f32 0.70710677, %v858_v30  ;;  %v962_v13 = vmul.f32 0.5, %v2917_v21 }
 0x196   : > { %v1121_v35 = vpack.c.bf16 %v1077_v28, %v1073_v27  ;;  %2382 = verf.f32 %v994_v29  ;;  %v998_v41 = vmul.f32 0.70710677, %v860_v33  ;;  %v965_v23 = vmul.f32 0.5, %v858_v30  ;;  %v2325_v27 = vld [vmem:[#allocation8 + $0x130] ss:$8 sps:$4 sm:$0xff]  }
 0x197   : > { %v2373_v37 = vpop.eup %2372  ;;  %v1122_v39 = vpack.c.bf16 %v1078_v32, %v1074_v31  ;;  %2384 = verf.f32 %v997_v36  ;;  %v966_v24 = vmul.f32 0.5, %v860_v33  ;;  %v2330_v31 = vld [vmem:[#allocation8 + $0x144] ss:$8 sps:$4 sm:$0xff]   ;;  %v2328_v30 = vld [vmem:[#allocation8 + $0x140] ss:$8 sps:$4 sm:$0xff]  }
 0x198   : > { %v2375_v48 = vpop.eup %2374  ;;  %v1049_v49 = vadd.f32 1.0, %v2373_v37  ;;  %v863_v52 = vpop.f32.mrb[12].mxu1  ;;  %2386 = verf.f32 %v998_v41 }
 0x199   : > { %v2377_v53 = vpop.eup %2376  ;;  %v1050_v54 = vadd.f32 1.0, %v2375_v48  ;;  %1553 = vmatprep.mubr.bf16.mxu0 %v1122_v39  ;;  %v864_v56 = vadd.f32 %v863_v52, %v2898_v46  ;;  %v865_v57 = vpop.f32.mrb[13].mxu1  ;;  %v2333_v39 = vld [vmem:[#allocation8 + $0x154] ss:$8 sps:$4 sm:$0xff]  }
 0x19a   : > { %v2379_v58 = vpop.eup %2378  ;;  %v1081_v59 = vmul.f32 %v1049_v49, %v953_v34  ;;  %v1053_v60 = vadd.f32 1.0, %v2377_v53  ;;  %1554 = vmatmul.mubr.bf16.vlgmr.msra.gmra.mrb[0].mxu0 %v1121_v35  ;;  %v866_v61 = vadd.f32 %v865_v57, %v2903_v47  ;;  %v867_v62 = vpop.f32.mrb[14].mxu1  ;;  %v2336_v57 = vld [vmem:[#allocation8 + $0x164] ss:$8 sps:$4 sm:$0xff]  }
 0x19b   : > { %v1082_v63 = vmul.f32 %v1050_v54, %v954_v38  ;;  %v1054_v0 = vadd.f32 1.0, %v2379_v58  ;;  %1595 = vmatpush1.bf16.msra.mxu0 %v2316_v40  ;;  %v1001_v2 = vmul.f32 0.70710677, %v864_v56  ;;  %v869_v3 = vpop.f32.mrb[15].mxu1  ;;  %v868_v7 = vadd.f32 %v867_v62, %v2898_v46  ;;  %v2327_v46 = vld [vmem:[#allocation8 + $0x134] ss:$8 sps:$4 sm:$0xff]  }
 0x19c   : > { %v1085_v4 = vmul.f32 %v1053_v60, %v957_v50  ;;  %1596 = vmatprep.subr.bf16.mxu0 %v2321_v51  ;;  %v1002_v6 = vmul.f32 0.70710677, %v866_v61  ;;  %v870_v9 = vadd.f32 %v869_v3, %v2903_v47  ;;  %v969_v35 = vmul.f32 0.5, %v864_v56  ;;  %v2331_v54 = vld [vmem:[#allocation8 + $0x150] ss:$8 sps:$4 sm:$0xff]  }
 0x19d   : > { %v1086_v8 = vmul.f32 %v1054_v0, %v958_v55  ;;  %2388 = verf.f32 %v1001_v2  ;;  %v1005_v10 = vmul.f32 0.70710677, %v868_v7  ;;  %v970_v33 = vmul.f32 0.5, %v866_v61  ;;  %v2334_v60 = vld [vmem:[#allocation8 + $0x160] ss:$8 sps:$4 sm:$0xff]  }
 0x19e   : > { %2390 = verf.f32 %v1002_v6  ;;  %v1125_v11 = vpack.c.bf16 %v1085_v4, %v1081_v59  ;;  %v1006_v17 = vmul.f32 0.70710677, %v870_v9  ;;  %v973_v48 = vmul.f32 0.5, %v868_v7  ;;  %v2339_v62 = vld [vmem:[#allocation8 + $0x174] ss:$8 sps:$4 sm:$0xff]  }
 0x19f   : > { %v2381_v12 = vpop.eup %2380  ;;  %1597 = vmatpush1.bf16.msra.mxu0 %v2319_v1  ;;  %v1126_v18 = vpack.c.bf16 %v1086_v8, %v1082_v63  ;;  %2392 = verf.f32 %v1005_v10  ;;  %v974_v50 = vmul.f32 0.5, %v870_v9  ;;  %v2337_v0 = vld [vmem:[#allocation8 + $0x170] ss:$8 sps:$4 sm:$0xff]   ;;  %v2342_v1 = vld [vmem:[#allocation8 + $0x184] ss:$8 sps:$4 sm:$0xff]   ;;  %v429_v4 = vsub.s32 2, %v2886_v42 }
 0x1a0   : > { %v2383_v19 = vpop.eup %2382  ;;  %v1057_v20 = vadd.f32 1.0, %v2381_v12  ;;  %1598 = vmatprep.subr.bf16.mxu0 %v2324_v5  ;;  %2394 = verf.f32 %v1006_v17  ;;  %v2340_v2 = vld [vmem:[#allocation8 + $0x180] ss:$8 sps:$4 sm:$0xff]   ;;  %v2345_v3 = vld [vmem:[#allocation8 + $0x194] ss:$8 sps:$4 sm:$0xff]   ;;  %v433_v5 = vsub.s32 3, %v2886_v42 }
 0x1a1   : > { %v1058_v22 = vadd.f32 1.0, %v2383_v19  ;;  %1563 = vmatprep.mubr.bf16.mxu0 %v1126_v18  ;;  %v2385_v47 = vpop.eup %2384  ;;  %v2343_v6 = vld [vmem:[#allocation8 + $0x190] ss:$8 sps:$4 sm:$0xff]   ;;  %v2348_v7 = vld [vmem:[#allocation8 + $0x1a4] ss:$8 sps:$4 sm:$0xff]   ;;  %v2932_v8 = vrot.slane %v2892_v44, %v429_v4 }
 0x1a2   : > { %1564 = vmatmul.mubr.bf16.gmra.mrb[4].mxu0 %v1125_v11  ;;  %v2387_v25 = vpop.eup %2386  ;;  %v1089_v15 = vmul.f32 %v1057_v20, %v961_v14  ;;  %v1061_v26 = vadd.f32 1.0, %v2385_v47  ;;  %v2935_v9 = vrot.slane %v2892_v44, %v433_v5  ;;  %v2346_v10 = vld [vmem:[#allocation8 + $0x1a0] ss:$8 sps:$4 sm:$0xff]   ;;  %v2351_v12 = vld [vmem:[#allocation8 + $0x1b4] ss:$8 sps:$4 sm:$0xff]  }
 0x1a3   : > { %1599 = vmatpush1.bf16.msra.mxu0 %v2322_v16  ;;  %v1090_v28 = vmul.f32 %v1058_v22, %v962_v13  ;;  %v1062_v29 = vadd.f32 1.0, %v2387_v25  ;;  %v2352_v25 = vld [vmem:[#allocation8 + $0x1c0] ss:$8 sps:$4 sm:$0xff]  }
 0x1a4   : > { %1600 = vmatprep.subr.bf16.mxu0 %v2327_v46  ;;  %v1093_v21 = vmul.f32 %v1061_v26, %v965_v23  ;;  %v2349_v46 = vld [vmem:[#allocation8 + $0x1b0] ss:$8 sps:$4 sm:$0xff]   ;;  %v2354_v23 = vld [vmem:[#allocation8 + $0x1c4] ss:$8 sps:$4 sm:$0xff]   ;;  %v2357_v26 = vld [vmem:[#allocation8 + $0x1d4] ss:$8 sps:$4 sm:$0xff]  }
 0x1a5   : > { %v1094_v32 = vmul.f32 %v1062_v29, %v966_v24 }
 0x1a6   : > { %v1129_v36 = vpack.c.bf16 %v1093_v21, %v1089_v15 }
 0x1a7   : > { %v2389_v34 = vpop.eup %2388  ;;  %1601 = vmatpush1.bf16.msra.mxu0 %v2325_v27  ;;  %v1130_v40 = vpack.c.bf16 %v1094_v32, %v1090_v28 }
 0x1a8   : > { %v2391_v37 = vpop.eup %2390  ;;  %v1065_v38 = vadd.f32 1.0, %v2389_v34  ;;  %1602 = vmatprep.subr.bf16.mxu0 %v2330_v31 }
 0x1a9   : > { %v1066_v41 = vadd.f32 1.0, %v2391_v37  ;;  %v2393_v49 = vpop.eup %2392  ;;  %1573 = vmatprep.mubr.bf16.mxu0 %v1130_v40  ;;  %v2360_v37 = vld [vmem:[#allocation8 + $0x1e4] ss:$8 sps:$4 sm:$0xff]   ;;  %v2358_v40 = vld [vmem:[#allocation8 + $0x1e0] ss:$8 sps:$4 sm:$0xff]  }
 0x1aa   : > { %v2395_v51 = vpop.eup %2394  ;;  %v1097_v52 = vmul.f32 %v1065_v38, %v969_v35  ;;  %v1069_v53 = vadd.f32 1.0, %v2393_v49  ;;  %1574 = vmatmul.mubr.bf16.gmra.mrb[8].mxu0 %v1129_v36  ;;  %v2355_v35 = vld [vmem:[#allocation8 + $0x1d0] ss:$8 sps:$4 sm:$0xff]  }
 0x1ab   : > { %1603 = vmatpush1.bf16.msra.mxu0 %v2328_v30  ;;  %v1098_v55 = vmul.f32 %v1066_v41, %v970_v33  ;;  %v1070_v56 = vadd.f32 1.0, %v2395_v51 }
 0x1ac   : > { %1604 = vmatprep.subr.bf16.mxu0 %v2333_v39  ;;  %v1101_v58 = vmul.f32 %v1069_v53, %v973_v48 }
 0x1ad   : > { %v1102_v59 = vmul.f32 %v1070_v56, %v974_v50  ;;  %v2363_v50 = vld [vmem:[#allocation8 + $0x1f4] ss:$8 sps:$4 sm:$0xff]  }
 0x1ae   : > { %v1133_v61 = vpack.c.bf16 %v1101_v58, %v1097_v52 }
 0x1af   : > { %1605 = vmatpush1.bf16.msra.mxu0 %v2331_v54  ;;  %v1134_v63 = vpack.c.bf16 %v1102_v59, %v1098_v55 }
 0x1b0   : > { %1606 = vmatprep.subr.bf16.mxu0 %v2336_v57 }
 0x1b1   : > { %1583 = vmatprep.mubr.bf16.mxu0 %v1134_v63 }
 0x1b2   : > { %1584 = vmatmul.mubr.bf16.gmra.mrb[12].mxu0 %v1133_v61  ;;  %v2361_v61 = vld [vmem:[#allocation8 + $0x1f0] ss:$8 sps:$4 sm:$0xff]  }
 0x1b3   : > { %1607 = vmatpush1.bf16.msra.mxu0 %v2334_v60 }
 0x1b4   : > { %1608 = vmatprep.subr.bf16.mxu0 %v2339_v62 }
 0x1b7   : > { %1609 = vmatpush1.bf16.msra.mxu0 %v2337_v0 }
 0x1b8   : > { %1610 = vmatprep.subr.bf16.mxu0 %v2342_v1 }
 0x1bb   : > { %1611 = vmatpush1.bf16.msra.mxu0 %v2340_v2 }
 0x1bc   : > { %1612 = vmatprep.subr.bf16.mxu0 %v2345_v3 }
 0x1bf   : > { %1613 = vmatpush1.bf16.msra.mxu0 %v2343_v6 }
 0x1c0   : > { %v906_v11 = vpop.f32.mrb[16].mxu1  ;;  %1614 = vmatprep.subr.bf16.mxu0 %v2348_v7 }
 0x1c1   : > { %v907_v14 = vadd.f32 %v906_v11, %v2932_v8  ;;  %v908_v16 = vpop.f32.mrb[17].mxu1 }
 0x1c2   : > { %v909_v17 = vadd.f32 %v908_v16, %v2935_v9  ;;  %v910_v18 = vpop.f32.mrb[18].mxu1 }
 0x1c3   : > { %v979_v19 = vmul.f32 0.70710677, %v907_v14  ;;  %v911_v20 = vadd.f32 %v910_v18, %v2932_v8  ;;  %v912_v13 = vpop.f32.mrb[19].mxu1  ;;  %1615 = vmatpush1.bf16.msra.mxu0 %v2346_v10  ;;  %v947_v56 = vmul.f32 0.5, %v907_v14 }
 0x1c4   : > { %v980_v22 = vmul.f32 0.70710677, %v909_v17  ;;  %v913_v44 = vadd.f32 %v912_v13, %v2935_v9  ;;  %1616 = vmatprep.subr.bf16.mxu0 %v2351_v12  ;;  %v948_v62 = vmul.f32 0.5, %v909_v17 }
 0x1c5   : > { %2396 = verf.f32 %v979_v19  ;;  %v983_v47 = vmul.f32 0.70710677, %v911_v20  ;;  %v951_v57 = vmul.f32 0.5, %v911_v20 }
 0x1c6   : > { %2398 = verf.f32 %v980_v22  ;;  %v984_v24 = vmul.f32 0.70710677, %v913_v44  ;;  %v952_v63 = vmul.f32 0.5, %v913_v44 }
 0x1c7   : > { %2400 = verf.f32 %v983_v47  ;;  %1617 = vmatpush1.bf16.msra.mxu0 %v2349_v46 }
 0x1c8   : > { %2402 = verf.f32 %v984_v24  ;;  %v916_v15 = vpop.f32.mrb[20].mxu1  ;;  %1618 = vmatprep.subr.bf16.mxu0 %v2354_v23 }
 0x1c9   : > { %v2942_v27 = vadd.f32 %v916_v15, %v2932_v8  ;;  %v918_v28 = vpop.f32.mrb[21].mxu1 }
 0x1ca   : > { %v2945_v29 = vadd.f32 %v918_v28, %v2935_v9  ;;  %v920_v31 = vpop.f32.mrb[22].mxu1 }
 0x1cb   : > { %v987_v21 = vmul.f32 0.70710677, %v2942_v27  ;;  %v2949_v32 = vadd.f32 %v920_v31, %v2932_v8  ;;  %v922_v34 = vpop.f32.mrb[23].mxu1  ;;  %1619 = vmatpush1.bf16.msra.mxu0 %v2352_v25  ;;  %v955_v24 = vmul.f32 0.5, %v2942_v27 }
 0x1cc   : > { %v988_v30 = vmul.f32 0.70710677, %v2945_v29  ;;  %v2953_v36 = vadd.f32 %v922_v34, %v2935_v9  ;;  %1620 = vmatprep.subr.bf16.mxu0 %v2357_v26  ;;  %v956_v31 = vmul.f32 0.5, %v2945_v29 }
 0x1cd   : > { %2404 = verf.f32 %v987_v21  ;;  %v991_v38 = vmul.f32 0.70710677, %v2949_v32  ;;  %v959_v25 = vmul.f32 0.5, %v2949_v32 }
 0x1ce   : > { %2406 = verf.f32 %v988_v30  ;;  %v992_v33 = vmul.f32 0.70710677, %v2953_v36  ;;  %v960_v21 = vmul.f32 0.5, %v2953_v36 }
 0x1cf   : > { %v2397_v39 = vpop.eup %2396  ;;  %2408 = verf.f32 %v991_v38  ;;  %1621 = vmatpush1.bf16.msra.mxu0 %v2355_v35 }
 0x1d0   : > { %v2399_v41 = vpop.eup %2398  ;;  %v1043_v48 = vadd.f32 1.0, %v2397_v39  ;;  %2410 = verf.f32 %v992_v33  ;;  %v926_v49 = vpop.f32.mrb[24].mxu1  ;;  %1622 = vmatprep.subr.bf16.mxu0 %v2360_v37 }
 0x1d1   : > { %v2401_v51 = vpop.eup %2400  ;;  %v1044_v52 = vadd.f32 1.0, %v2399_v41  ;;  %v2958_v53 = vadd.f32 %v926_v49, %v2932_v8  ;;  %v928_v54 = vpop.f32.mrb[25].mxu1 }
 0x1d2   : > { %v2403_v55 = vpop.eup %2402  ;;  %v1047_v58 = vadd.f32 1.0, %v2401_v51  ;;  %v2961_v59 = vadd.f32 %v928_v54, %v2935_v9  ;;  %v930_v60 = vpop.f32.mrb[26].mxu1  ;;  %v1075_v3 = vmul.f32 %v1043_v48, %v947_v56 }
 0x1d3   : > { %v1048_v0 = vadd.f32 1.0, %v2403_v55  ;;  %v995_v1 = vmul.f32 0.70710677, %v2958_v53  ;;  %v932_v2 = vpop.f32.mrb[27].mxu1  ;;  %1623 = vmatpush1.bf16.msra.mxu0 %v2358_v40  ;;  %v931_v6 = vadd.f32 %v930_v60, %v2932_v8  ;;  %v1076_v7 = vmul.f32 %v1044_v52, %v948_v62 }
 0x1d4   : > { %v1079_v4 = vmul.f32 %v1047_v58, %v951_v57  ;;  %v996_v5 = vmul.f32 0.70710677, %v2961_v59  ;;  %1624 = vmatprep.subr.bf16.mxu0 %v2363_v50  ;;  %v933_v11 = vadd.f32 %v932_v2, %v2935_v9  ;;  %v963_v55 = vmul.f32 0.5, %v2958_v53 }
 0x1d5   : > { %v1080_v10 = vmul.f32 %v1048_v0, %v952_v63  ;;  %2412 = verf.f32 %v995_v1  ;;  %v999_v14 = vmul.f32 0.70710677, %v931_v6  ;;  %v967_v56 = vmul.f32 0.5, %v931_v6 }
 0x1d6   : > { %v1123_v12 = vpack.c.bf16 %v1079_v4, %v1075_v3  ;;  %2414 = verf.f32 %v996_v5  ;;  %v1000_v17 = vmul.f32 0.70710677, %v933_v11  ;;  %v968_v58 = vmul.f32 0.5, %v933_v11 }
 0x1d7   : > { %v2405_v16 = vpop.eup %2404  ;;  %1625 = vmatpush1.bf16.msra.mxu0 %v2361_v61  ;;  %v1124_v18 = vpack.c.bf16 %v1080_v10, %v1076_v7  ;;  %2416 = verf.f32 %v999_v14 }
 0x1d8   : > { %v2407_v19 = vpop.eup %2406  ;;  %v1051_v20 = vadd.f32 1.0, %v2405_v16  ;;  %v936_v13 = vpop.f32.mrb[28].mxu1  ;;  %2418 = verf.f32 %v1000_v17 }
 0x1d9   : > { %v2409_v46 = vpop.eup %2408  ;;  %v1052_v22 = vadd.f32 1.0, %v2407_v19  ;;  %v937_v44 = vadd.f32 %v936_v13, %v2932_v8  ;;  %v938_v23 = vpop.f32.mrb[29].mxu1  ;;  %1626 = vmatprep.mubr.bf16.mxu0 %v1124_v18 }
 0x1da   : > { %v2411_v47 = vpop.eup %2410  ;;  %v1055_v15 = vadd.f32 1.0, %v2409_v46  ;;  %v939_v26 = vadd.f32 %v938_v23, %v2935_v9  ;;  %v940_v28 = vpop.f32.mrb[30].mxu1  ;;  %1627 = vmatmul.mubr.bf16.vlgmr.msra.gmra.mrb[0].mxu0 %v1123_v12  ;;  %v1083_v37 = vmul.f32 %v1051_v20, %v955_v24 }
 0x1db   : > { %v1056_v34 = vadd.f32 1.0, %v2411_v47  ;;  %v1003_v35 = vmul.f32 0.70710677, %v937_v44  ;;  %v942_v30 = vpop.f32.mrb[31].mxu1  ;;  %v941_v39 = vadd.f32 %v940_v28, %v2932_v8  ;;  %v1084_v27 = vmul.f32 %v1052_v22, %v956_v31  ;;  %v1718_v22 = vld [vmem:[%s3063_s4] sm:$0x3] }
 0x1dc   : > { %v1087_v38 = vmul.f32 %v1055_v15, %v959_v25  ;;  %v1004_v33 = vmul.f32 0.70710677, %v939_v26  ;;  %v943_v32 = vadd.f32 %v942_v30, %v2935_v9  ;;  %v964_v9 = vmul.f32 0.5, %v2961_v59 }
 0x1dd   : > { %v1088_v40 = vmul.f32 %v1056_v34, %v960_v21  ;;  %2420 = verf.f32 %v1003_v35  ;;  %v1007_v41 = vmul.f32 0.70710677, %v941_v39  ;;  %v971_v53 = vmul.f32 0.5, %v937_v44 }
 0x1de   : > { %2422 = verf.f32 %v1004_v33  ;;  %v1127_v48 = vpack.c.bf16 %v1087_v38, %v1083_v37  ;;  %v1008_v29 = vmul.f32 0.70710677, %v943_v32  ;;  %v975_v6 = vmul.f32 0.5, %v941_v39 }
 0x1df   : > { %v2413_v49 = vpop.eup %2412  ;;  %v1128_v50 = vpack.c.bf16 %v1088_v40, %v1084_v27  ;;  %2424 = verf.f32 %v1007_v41  ;;  %v972_v59 = vmul.f32 0.5, %v939_v26  ;;  %v976_v11 = vmul.f32 0.5, %v943_v32 }
 0x1e0   : > { %v2415_v36 = vpop.eup %2414  ;;  %v1059_v51 = vadd.f32 1.0, %v2413_v49  ;;  %2426 = verf.f32 %v1008_v29  ;;  %v1723_v44 = vrot.slane %v1718_v22, %v421_v43  ;;  %v1727_v23 = vrot.slane %v1718_v22, %v425_v45 }
 0x1e1   : > { %1636 = vmatprep.mubr.bf16.mxu0 %v1128_v50  ;;  %v2417_v52 = vpop.eup %2416  ;;  %v1060_v54 = vadd.f32 1.0, %v2415_v36 }
 0x1e2   : > { %1637 = vmatmul.mubr.bf16.gmra.mrb[4].mxu0 %v1127_v48  ;;  %v2419_v8 = vpop.eup %2418  ;;  %v1063_v57 = vadd.f32 1.0, %v2417_v52  ;;  %v1091_v61 = vmul.f32 %v1059_v51, %v963_v55 }
 0x1e3   : > { %v1064_v60 = vadd.f32 1.0, %v2419_v8  ;;  %v1092_v63 = vmul.f32 %v1060_v54, %v964_v9 }
 0x1e4   : > { %v1095_v62 = vmul.f32 %v1063_v57, %v967_v56 }
 0x1e5   : > { %v1096_v0 = vmul.f32 %v1064_v60, %v968_v58 }
 0x1e6   : > { %v1131_v2 = vpack.c.bf16 %v1095_v62, %v1091_v61 }
 0x1e7   : > { %v2421_v1 = vpop.eup %2420  ;;  %v1132_v4 = vpack.c.bf16 %v1096_v0, %v1092_v63 }
 0x1e8   : > { %v2423_v3 = vpop.eup %2422  ;;  %v1067_v5 = vadd.f32 1.0, %v2421_v1 }
 0x1e9   : > { %v2425_v7 = vpop.eup %2424  ;;  %v1068_v10 = vadd.f32 1.0, %v2423_v3  ;;  %1646 = vmatprep.mubr.bf16.mxu0 %v1132_v4 }
 0x1ea   : > { %v2427_v12 = vpop.eup %2426  ;;  %v1071_v14 = vadd.f32 1.0, %v2425_v7  ;;  %1647 = vmatmul.mubr.bf16.gmra.mrb[8].mxu0 %v1131_v2  ;;  %v1099_v17 = vmul.f32 %v1067_v5, %v971_v53 }
 0x1eb   : > { %v1072_v16 = vadd.f32 1.0, %v2427_v12  ;;  %v1100_v19 = vmul.f32 %v1068_v10, %v972_v59 }
 0x1ec   : > { %v1103_v18 = vmul.f32 %v1071_v14, %v975_v6 }
 0x1ed   : > { %v1104_v20 = vmul.f32 %v1072_v16, %v976_v11 }
 0x1ee   : > { %v1135_v13 = vpack.c.bf16 %v1103_v18, %v1099_v17 }
 0x1ef   : > { %v1136_v46 = vpack.c.bf16 %v1104_v20, %v1100_v19 }
 0x1f1   : > { %1656 = vmatprep.mubr.bf16.mxu0 %v1136_v46 }
 0x1f2   : > { %1657 = vmatmul.mubr.bf16.gmra.mrb[12].mxu0 %v1135_v13 }
 0x2ad   : > { %v1628_v47 = vpop.f32.mrb[0].mxu0 }
 0x2ae   : > { %v1730_v24 = vadd.f32 %v1723_v44, %v1628_v47  ;;  %v1630_v25 = vpop.f32.mrb[1].mxu0 }
 0x2af   : > { %v1731_v15 = vadd.f32 %v1727_v23, %v1630_v25  ;;  %v1632_v26 = vpop.f32.mrb[2].mxu0 }
 0x2b0   : > { %1746 = vst [vmem:[%s2985_s9] sm:$0xff] %v1730_v24  ;;  %v1732_v28 = vadd.f32 %v1723_v44, %v1632_v26  ;;  %v1634_v43 = vpop.f32.mrb[3].mxu0 }
 0x2b1   : > { %1747 = vst [vmem:[%s2985_s9 + $0x8] sm:$0xff] %v1731_v15  ;;  %v1733_v42 = vadd.f32 %v1727_v23, %v1634_v43 }
 0x2b2   : > { %1748 = vst [vmem:[%s2985_s9 + $0x10] sm:$0xff] %v1732_v28 }
 0x2b3   : > { %1749 = vst [vmem:[%s2985_s9 + $0x18] sm:$0xff] %v1733_v42 }
 0x2b5   : > { %v1638_v45 = vpop.f32.mrb[4].mxu0 }
 0x2b6   : > { %v1734_v31 = vadd.f32 %v1723_v44, %v1638_v45  ;;  %v1640_v21 = vpop.f32.mrb[5].mxu0 }
 0x2b7   : > { %v1735_v34 = vadd.f32 %v1727_v23, %v1640_v21  ;;  %v1642_v35 = vpop.f32.mrb[6].mxu0 }
 0x2b8   : > { %1750 = vst [vmem:[%s2985_s9 + $0x20] sm:$0xff] %v1734_v31  ;;  %v1736_v30 = vadd.f32 %v1723_v44, %v1642_v35  ;;  %v1644_v37 = vpop.f32.mrb[7].mxu0 }
 0x2b9   : > { %1751 = vst [vmem:[%s2985_s9 + $0x28] sm:$0xff] %v1735_v34  ;;  %v1737_v38 = vadd.f32 %v1727_v23, %v1644_v37 }
 0x2ba   : > { %1752 = vst [vmem:[%s2985_s9 + $0x30] sm:$0xff] %v1736_v30 }
 0x2bb   : > { %1753 = vst [vmem:[%s2985_s9 + $0x38] sm:$0xff] %v1737_v38 }
 0x2bd   : > { %v1648_v33 = vpop.f32.mrb[8].mxu0 }
 0x2be   : > { %v1738_v39 = vadd.f32 %v1723_v44, %v1648_v33  ;;  %v1650_v27 = vpop.f32.mrb[9].mxu0 }
 0x2bf   : > { %v1739_v40 = vadd.f32 %v1727_v23, %v1650_v27  ;;  %v1652_v32 = vpop.f32.mrb[10].mxu0 }
 0x2c0   : > { %1754 = vst [vmem:[%s2985_s9 + $0x40] sm:$0xff] %v1738_v39  ;;  %v1740_v41 = vadd.f32 %v1723_v44, %v1652_v32  ;;  %v1654_v48 = vpop.f32.mrb[11].mxu0 }
 0x2c1   : > { %1755 = vst [vmem:[%s2985_s9 + $0x48] sm:$0xff] %v1739_v40  ;;  %v1741_v49 = vadd.f32 %v1727_v23, %v1654_v48 }
 0x2c2   : > { %1756 = vst [vmem:[%s2985_s9 + $0x50] sm:$0xff] %v1740_v41 }
 0x2c3   : > { %1757 = vst [vmem:[%s2985_s9 + $0x58] sm:$0xff] %v1741_v49 }
 0x2c5   : > { %v1658_v29 = vpop.f32.mrb[12].mxu0 }
 0x2c6   : > { %v1742_v50 = vadd.f32 %v1723_v44, %v1658_v29  ;;  %v1660_v36 = vpop.f32.mrb[13].mxu0 }
 0x2c7   : > { %v1743_v51 = vadd.f32 %v1727_v23, %v1660_v36  ;;  %v1662_v52 = vpop.f32.mrb[14].mxu0 }
 0x2c8   : > { %1758 = vst [vmem:[%s2985_s9 + $0x60] sm:$0xff] %v1742_v50  ;;  %v1744_v54 = vadd.f32 %v1723_v44, %v1662_v52  ;;  %v1664_v8 = vpop.f32.mrb[15].mxu0 }
 0x2c9   : > { %1759 = vst [vmem:[%s2985_s9 + $0x68] sm:$0xff] %v1743_v51  ;;  %v1745_v55 = vadd.f32 %v1727_v23, %v1664_v8 }
 0x2ca   : > { %1760 = vst [vmem:[%s2985_s9 + $0x70] sm:$0xff] %v1744_v54 }
 0x2cb   : > { %1761 = vst [vmem:[%s2985_s9 + $0x78] sm:$0xff] %v1745_v55 }
 0x2cc   : > { %2527 = shalt.err (!%p2524_p11)
}
 0x2cd   : > { %s2528_s28 = scalar_lea.hbm %s3005_s14, 2048  ;;  %s2532_s6 = scalar_lea.hbm %s3064_s5, 4096 }
 0x2ce   : > { %p2529_p0 = scmp.ne.s32.totalorder %s3005_s14, %s2528_s28  ;;  %p2533_p6 = scmp.lt.u32.totalorder %s3005_s14, %s3064_s5 }
 0x2cf   : > { %p2534_p7 = scmp.lt.u32.totalorder %s2532_s6, %s2528_s28  ;;  %p2536_p8 = scmp.lt.u32.totalorder %s2528_s28, %s3005_s14 }
 0x2d0   : > { %p2530_p4 = pnand %p2529_p0, %p3081_p12 }
 0x2d1   : > { %p2535_p2 = por %p2534_p7, %p2533_p6 }
 0x2d2   : > { %p2531_p13 = pneg %p2530_p4 }
 0x2d3   : > { %p2537_p1 = por %p2536_p8, %p2535_p2 }
 0x2d5   : > { %p2538_p10 = pnand %p2537_p1, %p2531_p13 }
 0x2d7   : > { %2541 = shalt.err (!%p2538_p10)
}
 0x2d8   : > { %s2610_s16 = smov 256   ;;  %s2611_s7 = smov 16  }
 0x2d9   : > { %2081 = dma.vmem_to_hbm [thread:$0]  (%p3081_p12), %s3007_s13, 2048, %s3005_s14, %s1763_s21, %s2610_s16, %s2610_s16, %s2611_s7  }
 0x2da PF: > { %s1792_s27 = sand.u32 1, %s2580_s18   ;;  %p3082_p3 = scmp.ne.s32.totalorder %s3073_s29, 0 }
 0x2db   : > { %p3083_p5 = scmp.ge.s32.totalorder %s2600_s23, 2  ;;  %s1793_s15 = scalar_lea.sflag [#allocation5], %s1792_s27 }
 0x2dd   : > { %p2095_p9 = pnand %p3083_p5, %p3082_p3 }
 0x2df   : > { %2575 = dma.done.wait (!%p2095_p9), %s1793_s15, 2048  }
 0x2e0   : > { %2577 = vsyncadd (!%p2095_p9), %s1793_s15, 4294965248  ;;  %s22_s23 = sadd.s32 1, %s2600_s23   ;;  %s3084_s18 = smov %s2584_s19 }
 0x2e1   : > { %p19_p11 = scmp.ge.s32.totalorder %s22_s23, 4   ;;  %s3085_s19 = smov %s2588_s20 }
 0x2e2   : > { %s3086_s20 = smov %s2787_s17  ;;  %s3087_s21 = smov %s2596_s22 }
 0x2e3   : > { %s3088_s22 = smov %s3090_s12  ;;  %21 = sbr.rel (!%p19_p11) target bundleno = 7 (0x7), region = 106 }
 0x2ea   :  { %1798 = vsyncpa [#allocation4], 1 }
 0x2eb   :  { %1800 = vsyncpa [#allocation4 + $0x1], 1 }
 0x2ec   :  { %1801 = vsyncpa [#allocation7], 1 }
 0x2ed   :  { %1802 = vsyncpa [#allocation5], 1 }
 0x2ee   :  { %1804 = vsyncpa [#allocation5 + $0x1], 1 }

</bundles_post_ra>
